<compile_context>
chip_gen: v7x
topology: tpu7x:2x2x1
jax: 0.10.0
libtpu: 0.0.40
codegen_flags: <defaults>
</compile_context>

<pallas_src>
import functools
import math

import jax
import jax.numpy as jnp
import numpy as np
from jax import lax
from jax.experimental import pallas as pl
from jax.experimental.pallas import tpu as pltpu

LANE = 128
RSUB = 16          # row tile granularity (covers bf16 (16,128) packing)


def _rup(x, m):
    return (x + m - 1) // m * m


# -----------------------------------------------------------------------------
# Kernel (one batch tile per grid step)
# -----------------------------------------------------------------------------
def actor_critic_kernel(dims, enc_ref, eps_ref, wh_ref, wo_ref, w2_ref, out_ref):
    (TB, TBN, N, B, n_heads, key_dim, HK, Hp, Ap, Vp,
     off_e1, off_e2, off_qkv, off_ac1, off_std) = dims
    cdt = wh_ref.dtype                      # compute dtype for MXU operands
    f32 = jnp.float32

    def wblk(off, width):
        # weight block (rows 0..Hp-1) + its bias row (row Hp), f32 bias
        return (wh_ref[0:Hp, off:off + width],
                wh_ref[Hp:Hp + 1, off:off + width].astype(f32))

    # ---- shared encoder: ONE fused pass over the [own ; others] tile --------
    x = enc_ref[...]                                                  # (R, Hp)
    w1, b1 = wblk(off_e1, Hp)
    h1 = jnp.maximum(jnp.dot(x, w1, preferred_element_type=f32) + b1, 0.0)
    w2, b2 = wblk(off_e2, Hp)
    enc_f = jnp.maximum(
        jnp.dot(h1.astype(cdt), w2, preferred_element_type=f32) + b2, 0.0)
    enc_c = enc_f.astype(cdt)

    # ---- fused q/k/v projection (unpadded heads: 3*HK lanes) ----------------
    wqkv, bqkv = wblk(off_qkv, 3 * HK)
    qkv = (jnp.dot(enc_c, wqkv, preferred_element_type=f32) + bqkv).astype(cdt)

    q = qkv[0:TB, 0:HK]                    # own rows, q columns (scale folded)
    k = qkv[TB:TB + TBN, HK:2 * HK]        # other rows, k columns
    v = qkv[TB:TB + TBN, 2 * HK:3 * HK]    # other rows, v columns

    # additive block mask: own row r attends only to its N others; rows whose
    # global batch index >= B (padding of the last tile) are fully masked.
    row = lax.broadcasted_iota(jnp.int32, (TB, TBN), 0)
    col = lax.broadcasted_iota(jnp.int32, (TB, TBN), 1)
    g_row = row + pl.program_id(0) * TB
    valid = (col >= row * N) & (col < (row + 1) * N) & (g_row < B)
    bias_mask = jnp.where(valid, jnp.float32(0.0), jnp.float32(-1e9))

    heads = []
    for hd in range(n_heads):              # static loop, n_heads = 4
        lo = hd * key_dim
        qh = q[:, lo:lo + key_dim]         # 64-wide slices (small XLU relayout)
        kh = k[:, lo:lo + key_dim]
        vh = v[:, lo:lo + key_dim]
        s = lax.dot_general(qh, kh, (((1,), (1,)), ((), ())),
                            preferred_element_type=f32)              # (TB, TBN)
        s = s + bias_mask
        s = s - jnp.max(s, axis=-1, keepdims=True)
        e = jnp.exp(s)
        attn = e * pl.reciprocal(jnp.sum(e, axis=-1, keepdims=True), approx=True)
        heads.append(jnp.dot(attn.astype(cdt), vh, preferred_element_type=f32))
    head_cat = jnp.concatenate(heads, axis=-1).astype(cdt)           # (TB, HK)

    # attention output projection (unpadded HK rows)
    wo = wo_ref[0:HK, :]
    bo = wo_ref[HK:HK + 1, :].astype(f32)
    comm = jnp.dot(head_cat, wo, preferred_element_type=f32) + bo

    combined = (enc_f[0:TB, :] + comm).astype(cdt)                   # (TB, Hp)

    # ---- actor hidden & critic hidden fused into one matmul -----------------
    wac, bac = wblk(off_ac1, 2 * Hp)
    h_ac = jnp.maximum(
        jnp.dot(combined, wac, preferred_element_type=f32) + bac, 0.0)

    # ---- actor mean & critic value via one block-diagonal matmul ------------
    w2h = w2_ref[0:2 * Hp, :]
    b2h = w2_ref[2 * Hp:2 * Hp + 1, :].astype(f32)
    mv = jnp.dot(h_ac.astype(cdt), w2h, preferred_element_type=f32) + b2h

    # reparameterized sample: action = mean + exp(log_std) * eps
    # (exp(log_std) is pre-computed at pack time)
    std = wh_ref[Hp:Hp + 1, off_std:off_std + Ap].astype(f32)
    action = mv[:, 0:Ap] + std * eps_ref[...].astype(f32)

    # lane-dense combined output: [action | mean | value], 128-aligned stores
    out_ref[:, 0:Ap] = action
    out_ref[:, Ap:2 * Ap + Vp] = mv


# -----------------------------------------------------------------------------
# Host-side parameter packing (done once)
# -----------------------------------------------------------------------------
def pack_params(params, *, state_dim, action_dim, hidden_dim, n_heads, key_dim,
                dtype=jnp.bfloat16):
    Hp = _rup(max(hidden_dim, state_dim), LANE)
    HK = n_heads * key_dim                 # unpadded head lanes (256)
    Ap = _rup(action_dim, LANE)
    Vp = LANE

    off_e1 = 0
    off_e2 = Hp
    off_qkv = 2 * Hp
    off_ac1 = off_qkv + 3 * HK
    off_std = off_ac1 + 2 * Hp
    C = off_std + Ap
    rows = _rup(Hp + 1, RSUB)

    Wh = np.zeros((rows, C), np.float32)

    def put(w, b, off):
        w = np.asarray(w, np.float32)
        Wh[:w.shape[0], off:off + w.shape[1]] = w
        if b is not None:
            b = np.asarray(b, np.float32).reshape(-1)
            Wh[Hp, off:off + b.shape[0]] = b

    inv_scale = 1.0 / math.sqrt(key_dim)
    put(params['we1'], params['be1'], off_e1)
    put(params['we2'], params['be2'], off_e2)
    # fold 1/sqrt(key_dim) into wq and bq (exact, host-side)
    put(np.asarray(params['wq'], np.float32) * inv_scale,
        np.asarray(params['bq'], np.float32) * inv_scale, off_qkv)
    put(params['wk'], params['bk'], off_qkv + HK)
    put(params['wv'], params['bv'], off_qkv + 2 * HK)
    put(params['wa1'], params['ba1'], off_ac1)
    put(params['wc1'], params['bc1'], off_ac1 + Hp)
    # store exp(log_std) directly (no in-kernel exp)
    Wh[Hp, off_std:off_std + action_dim] = np.exp(
        np.asarray(params['logstd'], np.float32).reshape(-1))

    # attention output projection (unpadded HK rows) + its bias row
    wo_rows = _rup(HK + 1, RSUB)
    Wo = np.zeros((wo_rows, Hp), np.float32)
    Wo[:HK, :hidden_dim] = np.asarray(params['wo'], np.float32)
    Wo[HK, :hidden_dim] = np.asarray(params['bo'], np.float32).reshape(-1)

    # block-diagonal [actor_mean layer 2 | critic layer 2] + bias row
    w2_rows = _rup(2 * Hp + 1, RSUB)
    W2 = np.zeros((w2_rows, Ap + Vp), np.float32)
    W2[:hidden_dim, :action_dim] = np.asarray(params['wa2'], np.float32)
    W2[Hp:Hp + hidden_dim, Ap:Ap + 1] = np.asarray(params['wc2'], np.float32)
    W2[2 * Hp, :action_dim] = np.asarray(params['ba2'], np.float32).reshape(-1)
    W2[2 * Hp, Ap] = float(np.asarray(params['bc2'], np.float32).reshape(-1)[0])

    return dict(
        W_h=jnp.asarray(Wh, dtype), W_o=jnp.asarray(Wo, dtype),
        W_2=jnp.asarray(W2, dtype),
        dims=dict(state_dim=state_dim, action_dim=action_dim,
                  hidden_dim=hidden_dim, n_heads=n_heads, key_dim=key_dim,
                  HK=HK, Hp=Hp, Ap=Ap, Vp=Vp,
                  off_e1=off_e1, off_e2=off_e2, off_qkv=off_qkv,
                  off_ac1=off_ac1, off_std=off_std))


# -----------------------------------------------------------------------------
# Forward wrapper
# -----------------------------------------------------------------------------
def actor_critic_forward(self_state, others, eps, packed, *,
                         deterministic=False, batch_tile=64):
    d = packed['dims']
    B, S = self_state.shape
    _, N, _ = others.shape
    A = d['action_dim']
    Hp, Ap, Vp, HK, n_heads = d['Hp'], d['Ap'], d['Vp'], d['HK'], d['n_heads']
    cdt = packed['W_h'].dtype
    itemsize = jnp.dtype(cdt).itemsize

    # batch tile: keep TB*N (the quadratic score width) a few hundred lanes
    TB = _rup(min(batch_tile, _rup(B, RSUB)), RSUB)
    G = pl.cdiv(B, TB)
    TBN = TB * N
    R_tile = TB + TBN
    out_w = 2 * Ap + Vp

    # [own ; others] stacked per tile with pad + concatenate (no scatters)
    self_p = jnp.pad(self_state.astype(cdt), ((0, G * TB - B), (0, Hp - S)))
    oth_p = jnp.pad(others.reshape(B * N, S).astype(cdt),
                    ((0, G * TBN - B * N), (0, Hp - S)))
    enc_in = jnp.concatenate(
        [self_p.reshape(G, TB, Hp), oth_p.reshape(G, TBN, Hp)],
        axis=1).reshape(G * R_tile, Hp)

    # TODO(synk): torch Normal.rsample RNG has no in-kernel equivalent; the
    # reparameterization noise eps is generated on the host and passed in.
    if deterministic or eps is None:
        eps_p = jnp.zeros((G * TB, Ap), jnp.float32)
    else:
        eps_p = jnp.pad(eps.astype(jnp.float32), ((0, G * TB - B), (0, Ap - A)))

    dims = (TB, TBN, N, B, n_heads, d['key_dim'], HK, Hp, Ap, Vp,
            d['off_e1'], d['off_e2'], d['off_qkv'], d['off_ac1'], d['off_std'])

    # VMEM budget: resident weights + double-buffered row tiles + activations,
    # capped below v7x's 64 MiB physical VMEM.
    w_bytes = (packed['W_h'].size + packed['W_o'].size + packed['W_2'].size) * itemsize
    tile_bytes = 2 * (R_tile * Hp * itemsize + TB * Ap * 4 + TB * out_w * 4)
    act_bytes = 4 * (R_tile * (3 * Hp + 3 * HK)
                     + TB * (TBN * (n_heads + 2) + 2 * Hp + out_w))
    vlim = int(min(max(2 * (w_bytes + tile_bytes + act_bytes), 32 << 20), 48 << 20))

    wh, wo, w2 = packed['W_h'], packed['W_o'], packed['W_2']
    out = pl.pallas_call(
        functools.partial(actor_critic_kernel, dims),
        out_shape=jax.ShapeDtypeStruct((G * TB, out_w), jnp.float32),
        grid=(G,),
        in_specs=[
            pl.BlockSpec((R_tile, Hp), lambda i: (i, 0)),   # enc_in row tile
            pl.BlockSpec((TB, Ap), lambda i: (i, 0)),       # eps row tile
            pl.BlockSpec(wh.shape, lambda i: (0, 0)),       # weights: resident
            pl.BlockSpec(wo.shape, lambda i: (0, 0)),
            pl.BlockSpec(w2.shape, lambda i: (0, 0)),
        ],
        out_specs=pl.BlockSpec((TB, out_w), lambda i: (i, 0)),
        compiler_params=pltpu.CompilerParams(
            dimension_semantics=("parallel",),
            vmem_limit_bytes=vlim),
    )(enc_in, eps_p, wh, wo, w2)

    action = out[:B, 0:A]
    mean = out[:B, Ap:Ap + A]
    value = out[:B, 2 * Ap:2 * Ap + 1]
    return action, mean, value


# -----------------------------------------------------------------------------
# Parameter init + pure-JAX reference (mirrors the PyTorch module)
# -----------------------------------------------------------------------------
def init_params(key, state_dim, action_dim, hidden_dim, n_heads, key_dim):
    HK = n_heads * key_dim
    shapes = {
        'we1': (state_dim, hidden_dim), 'be1': (1, hidden_dim),
        'we2': (hidden_dim, hidden_dim), 'be2': (1, hidden_dim),
        'wq': (hidden_dim, HK), 'bq': (1, HK),
        'wk': (hidden_dim, HK), 'bk': (1, HK),
        'wv': (hidden_dim, HK), 'bv': (1, HK),
        'wo': (HK, hidden_dim), 'bo': (1, hidden_dim),
        'wa1': (hidden_dim, hidden_dim), 'ba1': (1, hidden_dim),
        'wa2': (hidden_dim, action_dim), 'ba2': (1, action_dim),
        'wc1': (hidden_dim, hidden_dim), 'bc1': (1, hidden_dim),
        'wc2': (hidden_dim, 1), 'bc2': (1, 1),
    }
    params = {}
    names = sorted(shapes)
    keys = jax.random.split(key, len(names))
    for k_, name in zip(keys, names):
        shp = shapes[name]
        fan_in = shp[0] if shp[0] > 1 else max(shp[1], 1)
        params[name] = jax.random.normal(k_, shp, jnp.float32) / np.sqrt(fan_in)
    params['logstd'] = jnp.zeros((1, action_dim), jnp.float32)  # actor_log_std
    return params


def reference_forward(self_state, others, eps, params, n_heads, key_dim):
    """Pure-JAX mirror of the PyTorch forward pass for verification."""
    B, N, S = others.shape

    def mlp2(x, w1, b1, w2, b2):
        h = jnp.maximum(x @ w1 + b1, 0.0)
        return jnp.maximum(h @ w2 + b2, 0.0)

    own = mlp2(self_state, params['we1'], params['be1'], params['we2'], params['be2'])
    oth = mlp2(others.reshape(B * N, S), params['we1'], params['be1'],
               params['we2'], params['be2']).reshape(B, N, -1)

    q = (own @ params['wq'] + params['bq']).reshape(B, 1, n_heads, key_dim).transpose(0, 2, 1, 3)
    k = (oth @ params['wk'] + params['bk']).reshape(B, N, n_heads, key_dim).transpose(0, 2, 1, 3)
    v = (oth @ params['wv'] + params['bv']).reshape(B, N, n_heads, key_dim).transpose(0, 2, 1, 3)
    scores = jnp.matmul(q, jnp.swapaxes(k, -1, -2)) / np.sqrt(key_dim)
    attn = jax.nn.softmax(scores, axis=-1)
    out = jnp.matmul(attn, v).transpose(0, 2, 1, 3).reshape(B, 1, n_heads * key_dim)
    comm = (out @ params['wo'] + params['bo'])[:, 0, :]

    combined = own + comm
    mean = jnp.maximum(combined @ params['wa1'] + params['ba1'], 0.0) @ params['wa2'] + params['ba2']
    std = jnp.exp(params['logstd'])
    action = mean + std * eps
    value = jnp.maximum(combined @ params['wc1'] + params['bc1'], 0.0) @ params['wc2'] + params['bc2']
    return action, mean, value


if __name__ == "__main__":
    # small shapes consistent with the module
    B, N_OTHERS, STATE_DIM, ACTION_DIM, HIDDEN = 2, 4, 16, 8, 32
    N_HEADS, KEY_DIM = 4, 64  # AttentionModule defaults

    key = jax.random.PRNGKey(0)
    k_self, k_oth, k_eps, k_par = jax.random.split(key, 4)
    self_state = jax.random.normal(k_self, (B, STATE_DIM), jnp.float32)
    others = jax.random.normal(k_oth, (B, N_OTHERS, STATE_DIM), jnp.float32)
    eps = jax.random.normal(k_eps, (B, ACTION_DIM), jnp.float32)

    params = init_params(k_par, STATE_DIM, ACTION_DIM, HIDDEN, N_HEADS, KEY_DIM)
    ref_action, ref_mean, ref_value = reference_forward(
        self_state, others, eps, params, N_HEADS, KEY_DIM)

    # bf16 weights/activations (v6e/v7x recommendation), f32 MXU accumulation.
    packed_bf16 = pack_params(params, state_dim=STATE_DIM, action_dim=ACTION_DIM,
                              hidden_dim=HIDDEN, n_heads=N_HEADS, key_dim=KEY_DIM,
                              dtype=jnp.bfloat16)
    a_b, m_b, v_b = jax.block_until_ready(
        actor_critic_forward(self_state, others, eps, packed_bf16,
                             deterministic=False))
    np.testing.assert_allclose(np.asarray(a_b), np.asarray(ref_action), rtol=3e-2, atol=3e-2)
    np.testing.assert_allclose(np.asarray(m_b), np.asarray(ref_mean), rtol=3e-2, atol=3e-2)
    np.testing.assert_allclose(np.asarray(v_b), np.asarray(ref_value), rtol=3e-2, atol=3e-2)

    # f32 weights for tight parity with the PyTorch reference (tolerance set by
    # the EUP approximate reciprocal used in the softmax normalization).
    packed_f32 = pack_params(params, state_dim=STATE_DIM, action_dim=ACTION_DIM,
                             hidden_dim=HIDDEN, n_heads=N_HEADS, key_dim=KEY_DIM,
                             dtype=jnp.float32)
    a_f, m_f, v_f = jax.block_until_ready(
        actor_critic_forward(self_state, others, eps, packed_f32,
                             deterministic=False))
    np.testing.assert_allclose(np.asarray(a_f), np.asarray(ref_action), rtol=1e-2, atol=1e-2)
    np.testing.assert_allclose(np.asarray(m_f), np.asarray(ref_mean), rtol=1e-2, atol=1e-2)
    np.testing.assert_allclose(np.asarray(v_f), np.asarray(ref_value), rtol=1e-2, atol=1e-2)

    print("KERNEL_OK")
</pallas_src>

<mosaic_0001>
module attributes {stable_mosaic.version = 11 : i64} {
  func.func @actor_critic_kernel(%arg0: i32, %arg1: memref<80x128xbf16, #tpu.memory_space<vmem>>, %arg2: memref<16x128xf32, #tpu.memory_space<vmem>>, %arg3: memref<144x1408xbf16, #tpu.memory_space<vmem>>, %arg4: memref<272x128xbf16, #tpu.memory_space<vmem>>, %arg5: memref<272x256xbf16, #tpu.memory_space<vmem>>, %arg6: memref<16x384xf32, #tpu.memory_space<vmem>>) attributes {dimension_semantics = [#tpu.dimension_semantics<parallel>], iteration_bounds = array<i64: 1>, scalar_prefetch = 0 : i64, scratch_operands = 0 : i64, tpu.core_type = #tpu.core_type<tc>, window_params = [{transform_indices = @transform_0, window_bounds = array<i64: 80, 128>}, {transform_indices = @transform_1, window_bounds = array<i64: 16, 128>}, {pipeline_mode = #tpu.pipeline_mode<synchronous>, transform_indices = @transform_2, window_bounds = array<i64: 144, 1408>}, {pipeline_mode = #tpu.pipeline_mode<synchronous>, transform_indices = @transform_3, window_bounds = array<i64: 272, 128>}, {pipeline_mode = #tpu.pipeline_mode<synchronous>, transform_indices = @transform_4, window_bounds = array<i64: 272, 256>}, {transform_indices = @transform_5, window_bounds = array<i64: 16, 384>}]} {
    %c0 = arith.constant 0 : index
    %c0_0 = arith.constant 0 : index
    %0 = vector.load %arg1[%c0, %c0_0] : memref<80x128xbf16, #tpu.memory_space<vmem>>, vector<80x128xbf16>
    %c0_1 = arith.constant 0 : index
    %c0_2 = arith.constant 0 : index
    %1 = vector.load %arg3[%c0_1, %c0_2] : memref<144x1408xbf16, #tpu.memory_space<vmem>>, vector<128x128xbf16>
    %c128 = arith.constant 128 : index
    %c0_3 = arith.constant 0 : index
    %2 = vector.load %arg3[%c128, %c0_3] : memref<144x1408xbf16, #tpu.memory_space<vmem>>, vector<1x128xbf16>
    %3 = arith.extf %2 : vector<1x128xbf16> to vector<1x128xf32>
    %cst = arith.constant dense<0.000000e+00> : vector<80x128xf32>
    %4 = tpu.matmul %0, %1, %cst {dimension_numbers = #tpu.dot_dimension_numbers<[1], [0], [0], [1], [0, 0, 1, 1], [], []>} : vector<80x128xbf16>, vector<128x128xbf16>, vector<80x128xf32> -> vector<80x128xf32>
    %5 = vector.broadcast %3 : vector<1x128xf32> to vector<80x128xf32>
    %6 = arith.addf %4, %5 : vector<80x128xf32>
    %cst_4 = arith.constant 0.000000e+00 : f32
    %7 = vector.broadcast %cst_4 : f32 to vector<80x128xf32>
    %8 = arith.maximumf %6, %7 : vector<80x128xf32>
    %c0_5 = arith.constant 0 : index
    %c128_6 = arith.constant 128 : index
    %9 = vector.load %arg3[%c0_5, %c128_6] : memref<144x1408xbf16, #tpu.memory_space<vmem>>, vector<128x128xbf16>
    %c128_7 = arith.constant 128 : index
    %c128_8 = arith.constant 128 : index
    %10 = vector.load %arg3[%c128_7, %c128_8] : memref<144x1408xbf16, #tpu.memory_space<vmem>>, vector<1x128xbf16>
    %11 = arith.extf %10 : vector<1x128xbf16> to vector<1x128xf32>
    %12 = arith.truncf %8 : vector<80x128xf32> to vector<80x128xbf16>
    %cst_9 = arith.constant dense<0.000000e+00> : vector<80x128xf32>
    %13 = tpu.matmul %12, %9, %cst_9 {dimension_numbers = #tpu.dot_dimension_numbers<[1], [0], [0], [1], [0, 0, 1, 1], [], []>} : vector<80x128xbf16>, vector<128x128xbf16>, vector<80x128xf32> -> vector<80x128xf32>
    %14 = vector.broadcast %11 : vector<1x128xf32> to vector<80x128xf32>
    %15 = arith.addf %13, %14 : vector<80x128xf32>
    %cst_10 = arith.constant 0.000000e+00 : f32
    %16 = vector.broadcast %cst_10 : f32 to vector<80x128xf32>
    %17 = arith.maximumf %15, %16 : vector<80x128xf32>
    %18 = arith.truncf %17 : vector<80x128xf32> to vector<80x128xbf16>
    %c0_11 = arith.constant 0 : index
    %c256 = arith.constant 256 : index
    %19 = vector.load %arg3[%c0_11, %c256] : memref<144x1408xbf16, #tpu.memory_space<vmem>>, vector<128x768xbf16>
    %c128_12 = arith.constant 128 : index
    %c256_13 = arith.constant 256 : index
    %20 = vector.load %arg3[%c128_12, %c256_13] : memref<144x1408xbf16, #tpu.memory_space<vmem>>, vector<1x768xbf16>
    %21 = arith.extf %20 : vector<1x768xbf16> to vector<1x768xf32>
    %cst_14 = arith.constant dense<0.000000e+00> : vector<80x768xf32>
    %22 = tpu.matmul %18, %19, %cst_14 {dimension_numbers = #tpu.dot_dimension_numbers<[1], [0], [0], [1], [0, 0, 1, 1], [], []>} : vector<80x128xbf16>, vector<128x768xbf16>, vector<80x768xf32> -> vector<80x768xf32>
    %23 = vector.broadcast %21 : vector<1x768xf32> to vector<80x768xf32>
    %24 = arith.addf %22, %23 : vector<80x768xf32>
    %25 = arith.truncf %24 : vector<80x768xf32> to vector<80x768xbf16>
    %26 = vector.extract_strided_slice %25 {offsets = [0, 0], sizes = [16, 256], strides = [1, 1]} : vector<80x768xbf16> to vector<16x256xbf16>
    %27 = vector.extract_strided_slice %25 {offsets = [16, 256], sizes = [64, 256], strides = [1, 1]} : vector<80x768xbf16> to vector<64x256xbf16>
    %28 = vector.extract_strided_slice %25 {offsets = [16, 512], sizes = [64, 256], strides = [1, 1]} : vector<80x768xbf16> to vector<64x256xbf16>
    %29 = tpu.iota {dimensions = array<i32: 0>} : vector<16x64xi32>
    %30 = tpu.iota {dimensions = array<i32: 1>} : vector<16x64xi32>
    %c16_i32 = arith.constant 16 : i32
    %31 = arith.muli %arg0, %c16_i32 : i32
    %32 = vector.broadcast %31 : i32 to vector<16x64xi32>
    %33 = arith.addi %29, %32 : vector<16x64xi32>
    %c4_i32 = arith.constant 4 : i32
    %34 = vector.broadcast %c4_i32 : i32 to vector<16x64xi32>
    %35 = arith.muli %29, %34 : vector<16x64xi32>
    %36 = arith.cmpi sge, %30, %35 : vector<16x64xi32>
    %c1_i32 = arith.constant 1 : i32
    %37 = vector.broadcast %c1_i32 : i32 to vector<16x64xi32>
    %38 = arith.addi %29, %37 : vector<16x64xi32>
    %c4_i32_15 = arith.constant 4 : i32
    %39 = vector.broadcast %c4_i32_15 : i32 to vector<16x64xi32>
    %40 = arith.muli %38, %39 : vector<16x64xi32>
    %41 = arith.cmpi slt, %30, %40 : vector<16x64xi32>
    %42 = arith.andi %36, %41 : vector<16x64xi1>
    %c2_i32 = arith.constant 2 : i32
    %43 = vector.broadcast %c2_i32 : i32 to vector<16x64xi32>
    %44 = arith.cmpi slt, %33, %43 : vector<16x64xi32>
    %45 = arith.andi %42, %44 : vector<16x64xi1>
    %cst_16 = arith.constant 0.000000e+00 : f32
    %cst_17 = arith.constant -1.000000e+09 : f32
    %46 = vector.broadcast %cst_16 : f32 to vector<16x64xf32>
    %47 = vector.broadcast %cst_17 : f32 to vector<16x64xf32>
    %48 = arith.select %45, %46, %47 : vector<16x64xi1>, vector<16x64xf32>
    %49 = vector.extract_strided_slice %26 {offsets = [0, 0], sizes = [16, 64], strides = [1, 1]} : vector<16x256xbf16> to vector<16x64xbf16>
    %50 = vector.extract_strided_slice %27 {offsets = [0, 0], sizes = [64, 64], strides = [1, 1]} : vector<64x256xbf16> to vector<64x64xbf16>
    %51 = vector.extract_strided_slice %28 {offsets = [0, 0], sizes = [64, 64], strides = [1, 1]} : vector<64x256xbf16> to vector<64x64xbf16>
    %cst_18 = arith.constant dense<0.000000e+00> : vector<16x64xf32>
    %52 = tpu.matmul %49, %50, %cst_18 {dimension_numbers = #tpu.dot_dimension_numbers<[1], [1], [0], [0], [0, 0, 1, 0], [], []>} : vector<16x64xbf16>, vector<64x64xbf16>, vector<16x64xf32> -> vector<16x64xf32>
    %53 = arith.addf %52, %48 : vector<16x64xf32>
    %cst_19 = arith.constant dense<0xFF800000> : vector<16xf32>
    %54 = vector.multi_reduction <maximumf>, %53, %cst_19 [1] : vector<16x64xf32> to vector<16xf32>
    %55 = vector.shape_cast %54 : vector<16xf32> to vector<16x1xf32>
    %56 = vector.broadcast %55 : vector<16x1xf32> to vector<16x64xf32>
    %57 = arith.subf %53, %56 : vector<16x64xf32>
    %58 = math.exp %57 : vector<16x64xf32>
    %cst_20 = arith.constant dense<0.000000e+00> : vector<16xf32>
    %59 = vector.multi_reduction <add>, %58, %cst_20 [1] : vector<16x64xf32> to vector<16xf32>
    %60 = vector.shape_cast %59 : vector<16xf32> to vector<16x1xf32>
    %61 = tpu.reciprocal %60 {approx = true} : vector<16x1xf32> -> vector<16x1xf32>
    %62 = vector.broadcast %61 : vector<16x1xf32> to vector<16x64xf32>
    %63 = arith.mulf %58, %62 : vector<16x64xf32>
    %64 = arith.truncf %63 : vector<16x64xf32> to vector<16x64xbf16>
    %cst_21 = arith.constant dense<0.000000e+00> : vector<16x64xf32>
    %65 = tpu.matmul %64, %51, %cst_21 {dimension_numbers = #tpu.dot_dimension_numbers<[1], [0], [0], [1], [0, 0, 1, 1], [], []>} : vector<16x64xbf16>, vector<64x64xbf16>, vector<16x64xf32> -> vector<16x64xf32>
    %66 = vector.extract_strided_slice %26 {offsets = [0, 64], sizes = [16, 64], strides = [1, 1]} : vector<16x256xbf16> to vector<16x64xbf16>
    %67 = vector.extract_strided_slice %27 {offsets = [0, 64], sizes = [64, 64], strides = [1, 1]} : vector<64x256xbf16> to vector<64x64xbf16>
    %68 = vector.extract_strided_slice %28 {offsets = [0, 64], sizes = [64, 64], strides = [1, 1]} : vector<64x256xbf16> to vector<64x64xbf16>
    %cst_22 = arith.constant dense<0.000000e+00> : vector<16x64xf32>
    %69 = tpu.matmul %66, %67, %cst_22 {dimension_numbers = #tpu.dot_dimension_numbers<[1], [1], [0], [0], [0, 0, 1, 0], [], []>} : vector<16x64xbf16>, vector<64x64xbf16>, vector<16x64xf32> -> vector<16x64xf32>
    %70 = arith.addf %69, %48 : vector<16x64xf32>
    %cst_23 = arith.constant dense<0xFF800000> : vector<16xf32>
    %71 = vector.multi_reduction <maximumf>, %70, %cst_23 [1] : vector<16x64xf32> to vector<16xf32>
    %72 = vector.shape_cast %71 : vector<16xf32> to vector<16x1xf32>
    %73 = vector.broadcast %72 : vector<16x1xf32> to vector<16x64xf32>
    %74 = arith.subf %70, %73 : vector<16x64xf32>
    %75 = math.exp %74 : vector<16x64xf32>
    %cst_24 = arith.constant dense<0.000000e+00> : vector<16xf32>
    %76 = vector.multi_reduction <add>, %75, %cst_24 [1] : vector<16x64xf32> to vector<16xf32>
    %77 = vector.shape_cast %76 : vector<16xf32> to vector<16x1xf32>
    %78 = tpu.reciprocal %77 {approx = true} : vector<16x1xf32> -> vector<16x1xf32>
    %79 = vector.broadcast %78 : vector<16x1xf32> to vector<16x64xf32>
    %80 = arith.mulf %75, %79 : vector<16x64xf32>
    %81 = arith.truncf %80 : vector<16x64xf32> to vector<16x64xbf16>
    %cst_25 = arith.constant dense<0.000000e+00> : vector<16x64xf32>
    %82 = tpu.matmul %81, %68, %cst_25 {dimension_numbers = #tpu.dot_dimension_numbers<[1], [0], [0], [1], [0, 0, 1, 1], [], []>} : vector<16x64xbf16>, vector<64x64xbf16>, vector<16x64xf32> -> vector<16x64xf32>
    %83 = vector.extract_strided_slice %26 {offsets = [0, 128], sizes = [16, 64], strides = [1, 1]} : vector<16x256xbf16> to vector<16x64xbf16>
    %84 = vector.extract_strided_slice %27 {offsets = [0, 128], sizes = [64, 64], strides = [1, 1]} : vector<64x256xbf16> to vector<64x64xbf16>
    %85 = vector.extract_strided_slice %28 {offsets = [0, 128], sizes = [64, 64], strides = [1, 1]} : vector<64x256xbf16> to vector<64x64xbf16>
    %cst_26 = arith.constant dense<0.000000e+00> : vector<16x64xf32>
    %86 = tpu.matmul %83, %84, %cst_26 {dimension_numbers = #tpu.dot_dimension_numbers<[1], [1], [0], [0], [0, 0, 1, 0], [], []>} : vector<16x64xbf16>, vector<64x64xbf16>, vector<16x64xf32> -> vector<16x64xf32>
    %87 = arith.addf %86, %48 : vector<16x64xf32>
    %cst_27 = arith.constant dense<0xFF800000> : vector<16xf32>
    %88 = vector.multi_reduction <maximumf>, %87, %cst_27 [1] : vector<16x64xf32> to vector<16xf32>
    %89 = vector.shape_cast %88 : vector<16xf32> to vector<16x1xf32>
    %90 = vector.broadcast %89 : vector<16x1xf32> to vector<16x64xf32>
    %91 = arith.subf %87, %90 : vector<16x64xf32>
    %92 = math.exp %91 : vector<16x64xf32>
    %cst_28 = arith.constant dense<0.000000e+00> : vector<16xf32>
    %93 = vector.multi_reduction <add>, %92, %cst_28 [1] : vector<16x64xf32> to vector<16xf32>
    %94 = vector.shape_cast %93 : vector<16xf32> to vector<16x1xf32>
    %95 = tpu.reciprocal %94 {approx = true} : vector<16x1xf32> -> vector<16x1xf32>
    %96 = vector.broadcast %95 : vector<16x1xf32> to vector<16x64xf32>
    %97 = arith.mulf %92, %96 : vector<16x64xf32>
    %98 = arith.truncf %97 : vector<16x64xf32> to vector<16x64xbf16>
    %cst_29 = arith.constant dense<0.000000e+00> : vector<16x64xf32>
    %99 = tpu.matmul %98, %85, %cst_29 {dimension_numbers = #tpu.dot_dimension_numbers<[1], [0], [0], [1], [0, 0, 1, 1], [], []>} : vector<16x64xbf16>, vector<64x64xbf16>, vector<16x64xf32> -> vector<16x64xf32>
    %100 = vector.extract_strided_slice %26 {offsets = [0, 192], sizes = [16, 64], strides = [1, 1]} : vector<16x256xbf16> to vector<16x64xbf16>
    %101 = vector.extract_strided_slice %27 {offsets = [0, 192], sizes = [64, 64], strides = [1, 1]} : vector<64x256xbf16> to vector<64x64xbf16>
    %102 = vector.extract_strided_slice %28 {offsets = [0, 192], sizes = [64, 64], strides = [1, 1]} : vector<64x256xbf16> to vector<64x64xbf16>
    %cst_30 = arith.constant dense<0.000000e+00> : vector<16x64xf32>
    %103 = tpu.matmul %100, %101, %cst_30 {dimension_numbers = #tpu.dot_dimension_numbers<[1], [1], [0], [0], [0, 0, 1, 0], [], []>} : vector<16x64xbf16>, vector<64x64xbf16>, vector<16x64xf32> -> vector<16x64xf32>
    %104 = arith.addf %103, %48 : vector<16x64xf32>
    %cst_31 = arith.constant dense<0xFF800000> : vector<16xf32>
    %105 = vector.multi_reduction <maximumf>, %104, %cst_31 [1] : vector<16x64xf32> to vector<16xf32>
    %106 = vector.shape_cast %105 : vector<16xf32> to vector<16x1xf32>
    %107 = vector.broadcast %106 : vector<16x1xf32> to vector<16x64xf32>
    %108 = arith.subf %104, %107 : vector<16x64xf32>
    %109 = math.exp %108 : vector<16x64xf32>
    %cst_32 = arith.constant dense<0.000000e+00> : vector<16xf32>
    %110 = vector.multi_reduction <add>, %109, %cst_32 [1] : vector<16x64xf32> to vector<16xf32>
    %111 = vector.shape_cast %110 : vector<16xf32> to vector<16x1xf32>
    %112 = tpu.reciprocal %111 {approx = true} : vector<16x1xf32> -> vector<16x1xf32>
    %113 = vector.broadcast %112 : vector<16x1xf32> to vector<16x64xf32>
    %114 = arith.mulf %109, %113 : vector<16x64xf32>
    %115 = arith.truncf %114 : vector<16x64xf32> to vector<16x64xbf16>
    %cst_33 = arith.constant dense<0.000000e+00> : vector<16x64xf32>
    %116 = tpu.matmul %115, %102, %cst_33 {dimension_numbers = #tpu.dot_dimension_numbers<[1], [0], [0], [1], [0, 0, 1, 1], [], []>} : vector<16x64xbf16>, vector<64x64xbf16>, vector<16x64xf32> -> vector<16x64xf32>
    %117 = tpu.concatenate %65, %82, %99, %116 in 1 : vector<16x64xf32>, vector<16x64xf32>, vector<16x64xf32>, vector<16x64xf32> -> vector<16x256xf32>
    %118 = arith.truncf %117 : vector<16x256xf32> to vector<16x256xbf16>
    %c0_34 = arith.constant 0 : index
    %c0_35 = arith.constant 0 : index
    %119 = vector.load %arg4[%c0_34, %c0_35] : memref<272x128xbf16, #tpu.memory_space<vmem>>, vector<256x128xbf16>
    %c256_36 = arith.constant 256 : index
    %c0_37 = arith.constant 0 : index
    %120 = vector.load %arg4[%c256_36, %c0_37] : memref<272x128xbf16, #tpu.memory_space<vmem>>, vector<1x128xbf16>
    %121 = arith.extf %120 : vector<1x128xbf16> to vector<1x128xf32>
    %cst_38 = arith.constant dense<0.000000e+00> : vector<16x128xf32>
    %122 = tpu.matmul %118, %119, %cst_38 {dimension_numbers = #tpu.dot_dimension_numbers<[1], [0], [0], [1], [0, 0, 1, 1], [], []>} : vector<16x256xbf16>, vector<256x128xbf16>, vector<16x128xf32> -> vector<16x128xf32>
    %123 = vector.broadcast %121 : vector<1x128xf32> to vector<16x128xf32>
    %124 = arith.addf %122, %123 : vector<16x128xf32>
    %125 = vector.extract_strided_slice %17 {offsets = [0, 0], sizes = [16, 128], strides = [1, 1]} : vector<80x128xf32> to vector<16x128xf32>
    %126 = arith.addf %125, %124 : vector<16x128xf32>
    %127 = arith.truncf %126 : vector<16x128xf32> to vector<16x128xbf16>
    %c0_39 = arith.constant 0 : index
    %c1024 = arith.constant 1024 : index
    %128 = vector.load %arg3[%c0_39, %c1024] : memref<144x1408xbf16, #tpu.memory_space<vmem>>, vector<128x256xbf16>
    %c128_40 = arith.constant 128 : index
    %c1024_41 = arith.constant 1024 : index
    %129 = vector.load %arg3[%c128_40, %c1024_41] : memref<144x1408xbf16, #tpu.memory_space<vmem>>, vector<1x256xbf16>
    %130 = arith.extf %129 : vector<1x256xbf16> to vector<1x256xf32>
    %cst_42 = arith.constant dense<0.000000e+00> : vector<16x256xf32>
    %131 = tpu.matmul %127, %128, %cst_42 {dimension_numbers = #tpu.dot_dimension_numbers<[1], [0], [0], [1], [0, 0, 1, 1], [], []>} : vector<16x128xbf16>, vector<128x256xbf16>, vector<16x256xf32> -> vector<16x256xf32>
    %132 = vector.broadcast %130 : vector<1x256xf32> to vector<16x256xf32>
    %133 = arith.addf %131, %132 : vector<16x256xf32>
    %cst_43 = arith.constant 0.000000e+00 : f32
    %134 = vector.broadcast %cst_43 : f32 to vector<16x256xf32>
    %135 = arith.maximumf %133, %134 : vector<16x256xf32>
    %c0_44 = arith.constant 0 : index
    %c0_45 = arith.constant 0 : index
    %136 = vector.load %arg5[%c0_44, %c0_45] : memref<272x256xbf16, #tpu.memory_space<vmem>>, vector<256x256xbf16>
    %c256_46 = arith.constant 256 : index
    %c0_47 = arith.constant 0 : index
    %137 = vector.load %arg5[%c256_46, %c0_47] : memref<272x256xbf16, #tpu.memory_space<vmem>>, vector<1x256xbf16>
    %138 = arith.extf %137 : vector<1x256xbf16> to vector<1x256xf32>
    %139 = arith.truncf %135 : vector<16x256xf32> to vector<16x256xbf16>
    %cst_48 = arith.constant dense<0.000000e+00> : vector<16x256xf32>
    %140 = tpu.matmul %139, %136, %cst_48 {dimension_numbers = #tpu.dot_dimension_numbers<[1], [0], [0], [1], [0, 0, 1, 1], [], []>} : vector<16x256xbf16>, vector<256x256xbf16>, vector<16x256xf32> -> vector<16x256xf32>
    %141 = vector.broadcast %138 : vector<1x256xf32> to vector<16x256xf32>
    %142 = arith.addf %140, %141 : vector<16x256xf32>
    %c128_49 = arith.constant 128 : index
    %c1280 = arith.constant 1280 : index
    %143 = vector.load %arg3[%c128_49, %c1280] : memref<144x1408xbf16, #tpu.memory_space<vmem>>, vector<1x128xbf16>
    %144 = arith.extf %143 : vector<1x128xbf16> to vector<1x128xf32>
    %145 = vector.extract_strided_slice %142 {offsets = [0, 0], sizes = [16, 128], strides = [1, 1]} : vector<16x256xf32> to vector<16x128xf32>
    %c0_50 = arith.constant 0 : index
    %c0_51 = arith.constant 0 : index
    %146 = vector.load %arg2[%c0_50, %c0_51] : memref<16x128xf32, #tpu.memory_space<vmem>>, vector<16x128xf32>
    %147 = vector.broadcast %144 : vector<1x128xf32> to vector<16x128xf32>
    %148 = arith.mulf %147, %146 : vector<16x128xf32>
    %149 = arith.addf %145, %148 : vector<16x128xf32>
    %c0_52 = arith.constant 0 : index
    %c0_53 = arith.constant 0 : index
    %150 = vector.load %arg6[%c0_52, %c0_53] : memref<16x384xf32, #tpu.memory_space<vmem>>, vector<16x128xf32>
    tpu.vector_store %arg6[%c0_52, %c0_53], %149 {strides = array<i32>} : memref<16x384xf32, #tpu.memory_space<vmem>>, vector<16x128xf32>,
    %c0_54 = arith.constant 0 : index
    %c128_55 = arith.constant 128 : index
    %151 = vector.load %arg6[%c0_54, %c128_55] : memref<16x384xf32, #tpu.memory_space<vmem>>, vector<16x256xf32>
    tpu.vector_store %arg6[%c0_54, %c128_55], %142 {strides = array<i32>} : memref<16x384xf32, #tpu.memory_space<vmem>>, vector<16x256xf32>,
    return
  }
  func.func @transform_0(%arg0: i32) -> (i32, i32) {
    %c0_i32 = arith.constant 0 : i32
    %c0_i32_0 = arith.constant 0 : i32
    return %arg0, %c0_i32 : i32, i32
  }
  func.func @transform_1(%arg0: i32) -> (i32, i32) {
    %c0_i32 = arith.constant 0 : i32
    %c0_i32_0 = arith.constant 0 : i32
    return %arg0, %c0_i32 : i32, i32
  }
  func.func @transform_2(%arg0: i32) -> (i32, i32) {
    %c0_i32 = arith.constant 0 : i32
    %c0_i32_0 = arith.constant 0 : i32
    %c0_i32_1 = arith.constant 0 : i32
    return %c0_i32, %c0_i32_0 : i32, i32
  }
  func.func @transform_3(%arg0: i32) -> (i32, i32) {
    %c0_i32 = arith.constant 0 : i32
    %c0_i32_0 = arith.constant 0 : i32
    %c0_i32_1 = arith.constant 0 : i32
    return %c0_i32, %c0_i32_0 : i32, i32
  }
  func.func @transform_4(%arg0: i32) -> (i32, i32) {
    %c0_i32 = arith.constant 0 : i32
    %c0_i32_0 = arith.constant 0 : i32
    %c0_i32_1 = arith.constant 0 : i32
    return %c0_i32, %c0_i32_0 : i32, i32
  }
  func.func @transform_5(%arg0: i32) -> (i32, i32) {
    %c0_i32 = arith.constant 0 : i32
    %c0_i32_0 = arith.constant 0 : i32
    return %arg0, %c0_i32 : i32, i32
  }
}

</mosaic_0001>

<bundles_post_ra>
// kernel: tpu_custom_call.1
= control target key start
LH: loop header
LB: loop body
LE: loop exit
PB: predicated region body
PF: predicated region fallthrough
CT: control target
= control target key end

     0   :  { %10 = vsyncpa [#allocation3], 0  ;;  %s3463_s0 = inlined_call_operand.hbm [shape: bf16[80,128], index: 0, kind: input, shape index: {}]   ;;  %s3464_s1 = inlined_call_operand.hbm [shape: f32[16,128], index: 1, kind: input, shape index: {}]   ;;  %s3465_s2 = inlined_call_operand.hbm [shape: bf16[144,1408], index: 2, kind: input, shape index: {}]   ;;  %s3466_s3 = inlined_call_operand.hbm [shape: bf16[272,128], index: 3, kind: input, shape index: {}]   ;;  %s3467_s4 = inlined_call_operand.hbm [shape: bf16[272,256], index: 4, kind: input, shape index: {}]   ;;  %s3468_s5 = inlined_call_operand.hbm [shape: f32[16,384], index: 5, kind: output, shape index: {}]  }
   0x1   :  { %11 = vsyncpa [#allocation6], 0 }
   0x2   :  { %12 = vsyncpa [#allocation9], 0 }
   0x3   :  { %13 = vsyncpa [#allocation4], 0  ;;  %s3009_s18 = smov [#allocation5]   ;;  %s2869_s22 = scalar_lea.hbm %s3464_s1, 256 }
   0x4   :  { %s31_s19 = sshll.u32 %s3009_s18, 4  ;;  %p2870_p0 = scmp.ne.s32.totalorder %s3464_s1, %s2869_s22  ;;  %s32_s19 = int_to_ptr.vmem [resolvable:$true] %s31_s19 }
   0x5   :  { %p2873_p1 = scmp.lt.u32.totalorder %s2869_s22, %s3464_s1 }
   0x7   :  { %p2875_p2 = pnand %p2873_p1, %p2870_p0 }
   0x9   :  { %2878 = shalt.err (!%p2875_p2)
}
   0xa   :  { %s2879_s27 = scalar_lea.vmem %s32_s19, 256  ;;  %p2884_p4 = scmp.lt.s32.totalorder %s32_s19, %s32_s19 }
   0xb   :  { %p2880_p3 = scmp.ne.s32.totalorder %s32_s19, %s2879_s27  ;;  %p2885_p5 = scmp.lt.s32.totalorder %s2879_s27, %s2879_s27 }
   0xd   :  { %p2886_p6 = por %p2885_p5, %p2884_p4 }
   0xf   :  { %p2887_p7 = pnand %p2886_p6, %p2880_p3 }
  0x11   :  { %2890 = shalt.err (!%p2887_p7)
}
  0x12   :  { %s3010_s28 = smov 128   ;;  %s3011_s29 = smov 8  }
  0x13   :  { %37 = dma.hbm_to_vmem [thread:$0]  %s3464_s1, 256, %s32_s19, [#allocation6], %s3010_s28, %s3010_s28, %s3011_s29  }
  0x14   :  { %s3012_s7 = smov [#allocation8]   ;;  %s3013_s9 = smov [#allocation2]  }
  0x15   :  { %s55_s8 = sshll.u32 %s3012_s7, 4  ;;  %s19_s10 = sshll.u32 %s3013_s9, 4  ;;  %s56_s8 = int_to_ptr.vmem [resolvable:$true] %s55_s8  ;;  %s20_s10 = int_to_ptr.vmem [resolvable:$true] %s19_s10 }
  0x16   :  { %s2891_s13 = scalar_lea.hbm %s3466_s3, 2176 }
  0x17   :  { %p2892_p8 = scmp.ne.s32.totalorder %s3466_s3, %s2891_s13  ;;  %p2895_p9 = scmp.lt.u32.totalorder %s2891_s13, %s3466_s3 }
  0x19   :  { %p2897_p10 = pnand %p2895_p9, %p2892_p8 }
  0x1b   :  { %2900 = shalt.err (!%p2897_p10)
}
  0x1c   :  { %s2901_s1 = scalar_lea.vmem %s56_s8, 2176  ;;  %p2906_p12 = scmp.lt.s32.totalorder %s56_s8, %s56_s8 }
  0x1d   :  { %p2902_p11 = scmp.ne.s32.totalorder %s56_s8, %s2901_s1  ;;  %p2907_p13 = scmp.lt.s32.totalorder %s2901_s1, %s2901_s1 }
  0x1f   :  { %p2908_p0 = por %p2907_p13, %p2906_p12 }
  0x21   :  { %p2909_p1 = pnand %p2908_p0, %p2902_p11 }
  0x23   :  { %2912 = shalt.err (!%p2909_p1)
}
  0x24   :  { %s3014_s18 = smov 64   ;;  %s3015_s19 = smov 4  }
  0x25   :  { %61 = dma.hbm_to_vmem [thread:$0]  %s3466_s3, 2176, %s56_s8, [#allocation9], %s3014_s18, %s3014_s18, %s3015_s19  }
  0x26   :  { %s2913_s24 = scalar_lea.hbm %s3463_s0, 640 }
  0x27   :  { %p2914_p2 = scmp.ne.s32.totalorder %s3463_s0, %s2913_s24  ;;  %p2917_p3 = scmp.lt.u32.totalorder %s2913_s24, %s3463_s0 }
  0x29   :  { %p2919_p4 = pnand %p2917_p3, %p2914_p2 }
  0x2b   :  { %2922 = shalt.err (!%p2919_p4)
}
  0x2c   :  { %s2923_s6 = scalar_lea.vmem %s20_s10, 640  ;;  %p2928_p6 = scmp.lt.s32.totalorder %s20_s10, %s20_s10 }
  0x2d   :  { %p2924_p5 = scmp.ne.s32.totalorder %s20_s10, %s2923_s6  ;;  %p2929_p7 = scmp.lt.s32.totalorder %s2923_s6, %s2923_s6 }
  0x2f   :  { %p2930_p8 = por %p2929_p7, %p2928_p6 }
  0x31   :  { %p2931_p9 = pnand %p2930_p8, %p2924_p5 }
  0x33   :  { %2934 = shalt.err (!%p2931_p9)
}
  0x34   :  { %25 = dma.hbm_to_vmem [thread:$0]  %s3463_s0, 640, %s20_s10, [#allocation3], %s3014_s18, %s3014_s18, %s3015_s19  }
  0x35   :  { %s3016_s8 = smov [#allocation7]   ;;  %s2935_s13 = scalar_lea.hbm %s3465_s2, 12672 }
  0x36   :  { %s43_s9 = sshll.u32 %s3016_s8, 4  ;;  %p2936_p10 = scmp.ne.s32.totalorder %s3465_s2, %s2935_s13  ;;  %s44_s9 = int_to_ptr.vmem [resolvable:$true] %s43_s9 }
  0x37   :  { %p2939_p11 = scmp.lt.u32.totalorder %s2935_s13, %s3465_s2 }
  0x39   :  { %p2941_p12 = pnand %p2939_p11, %p2936_p10 }
  0x3b   :  { %2944 = shalt.err (!%p2941_p12)
}
  0x3c   :  { %s2945_s1 = scalar_lea.vmem %s44_s9, 12672  ;;  %p2950_p0 = scmp.lt.s32.totalorder %s44_s9, %s44_s9 }
  0x3d   :  { %p2946_p13 = scmp.ne.s32.totalorder %s44_s9, %s2945_s1  ;;  %p2951_p1 = scmp.lt.s32.totalorder %s2945_s1, %s2945_s1 }
  0x3f   :  { %p2952_p2 = por %p2951_p1, %p2950_p0 }
  0x41   :  { %p2953_p3 = pnand %p2952_p2, %p2946_p13 }
  0x43   :  { %2956 = shalt.err (!%p2953_p3)
}
  0x44   :  { %s3017_s0 = smov 704   ;;  %s3018_s10 = smov 44  }
  0x45   :  { %49 = dma.hbm_to_vmem [thread:$0]  %s3465_s2, 12672, %s44_s9, [#allocation6], %s3017_s0, %s3017_s0, %s3018_s10  }
  0x46   :  { %s3019_s21 = smov [#allocation10]   ;;  %s2957_s25 = scalar_lea.hbm %s3467_s4, 4352 }
  0x47   :  { %s67_s22 = sshll.u32 %s3019_s21, 4  ;;  %p2958_p4 = scmp.ne.s32.totalorder %s3467_s4, %s2957_s25  ;;  %s68_s22 = int_to_ptr.vmem [resolvable:$true] %s67_s22 }
  0x48   :  { %p2961_p5 = scmp.lt.u32.totalorder %s2957_s25, %s3467_s4 }
  0x4a   :  { %p2963_p6 = pnand %p2961_p5, %p2958_p4 }
  0x4c   :  { %2966 = shalt.err (!%p2963_p6)
}
  0x4d   :  { %s2967_s3 = scalar_lea.vmem %s68_s22, 4352  ;;  %p2972_p8 = scmp.lt.s32.totalorder %s68_s22, %s68_s22 }
  0x4e   :  { %p2968_p7 = scmp.ne.s32.totalorder %s68_s22, %s2967_s3  ;;  %p2973_p9 = scmp.lt.s32.totalorder %s2967_s3, %s2967_s3 }
  0x50   :  { %p2974_p10 = por %p2973_p9, %p2972_p8 }
  0x52   :  { %p2975_p11 = pnand %p2974_p10, %p2968_p7 }
  0x54   :  { %2978 = shalt.err (!%p2975_p11)
}
  0x55   :  { %73 = dma.hbm_to_vmem [thread:$0]  %s3467_s4, 4352, %s68_s22, [#allocation9], %s3010_s28, %s3010_s28, %s3011_s29  }
  0x56   :  { %3001 = dma.done.wait [#allocation3], 640  }
  0x57   :  { %3002 = vsyncadd [#allocation3], 4294966656 }
  0x58   :  { %3003 = dma.done.wait [#allocation6], 12928  }
  0x59   :  { %3004 = vsyncadd [#allocation6], 4294954368 }
  0x5a   :  { %3005 = dma.done.wait [#allocation9], 6528  }
  0x5b   :  { %3006 = vsyncadd [#allocation9], 4294960768  ;;  %v3020_v0 = vmov 0.0   ;;  %vm3021_vm0 = vmmov 0   ;;  %v2656_v1 = vld [vmem:[#allocation7] ss:$44 sps:$4 sm:$0xff]   ;;  %v118_v35 = vlaneseq }
  0x5c   :  { %2460 = vmatprep.subr.bf16.mxu0 %v3020_v0  ;;  %2476 = vmatprep.mubr.msk.bf16.mxu0 %vm3021_vm0, %v3020_v0  ;;  %v2657_v2 = vld [vmem:[#allocation7 + $0x58] ss:$44 sps:$4 sm:$0xff]   ;;  %v2658_v3 = vld [vmem:[#allocation7 + $0xb0] ss:$44 sps:$4 sm:$0xff]   ;;  %v2659_v4 = vld [vmem:[#allocation7 + $0x108] ss:$44 sps:$4 sm:$0xff]  }
  0x5d   :  { %2496 = vmatprep.subr.bf16.mxu1 %v3020_v0  ;;  %2512 = vmatprep.mubr.msk.bf16.mxu1 %vm3021_vm0, %v3020_v0  ;;  %v2669_v5 = vld [vmem:[#allocation7 + $0x4] ss:$44 sps:$4 sm:$0xff]   ;;  %v2660_v6 = vld [vmem:[#allocation7 + $0x160] ss:$44 sps:$4 sm:$0xff]   ;;  %v2670_v7 = vld [vmem:[#allocation7 + $0x5c] ss:$44 sps:$4 sm:$0xff]  }
  0x5e   :  { %2461 = vmatpush3.bf16.msra.mxu0 %v2656_v1  ;;  %2497 = vmatpush3.bf16.msra.mxu1 %v2669_v5  ;;  %v2661_v8 = vld [vmem:[#allocation7 + $0x1b8] ss:$44 sps:$4 sm:$0xff]   ;;  %v2671_v9 = vld [vmem:[#allocation7 + $0xb4] ss:$44 sps:$4 sm:$0xff]   ;;  %v2662_v10 = vld [vmem:[#allocation7 + $0x210] ss:$44 sps:$4 sm:$0xff]  }
  0x5f   :  { %2462 = vmatprep.subr.bf16.mxu0 %v3020_v0  ;;  %2498 = vmatprep.subr.bf16.mxu1 %v3020_v0  ;;  %v2672_v11 = vld [vmem:[#allocation7 + $0x10c] ss:$44 sps:$4 sm:$0xff]   ;;  %v2663_v12 = vld [vmem:[#allocation7 + $0x268] ss:$44 sps:$4 sm:$0xff]   ;;  %v2673_v13 = vld [vmem:[#allocation7 + $0x164] ss:$44 sps:$4 sm:$0xff]  }
  0x60   :  { %v2664_v14 = vld [vmem:[#allocation2] sm:$0xff]   ;;  %v2665_v16 = vld [vmem:[#allocation2 + $0x8] sm:$0xff]   ;;  %v2666_v17 = vld [vmem:[#allocation2 + $0x10] sm:$0xff]   ;;  %v3156_v36 = vshrl.u32 %v118_v35, 7  ;;  %vm1037_vm1 = vcmask 523264   ;;  %s3024_s4 = smov [#allocation11]  }
  0x61   :  { %v2674_v15 = vld [vmem:[#allocation7 + $0x1bc] ss:$44 sps:$4 sm:$0xff]   ;;  %v2667_v18 = vld [vmem:[#allocation2 + $0x18] sm:$0xff]   ;;  %v2676_v21 = vld [vmem:[#allocation7 + $0x26c] ss:$44 sps:$4 sm:$0xff]   ;;  %s2217_s28 = sshll.u32 %s3024_s4, 4  ;;  %s2218_s28 = int_to_ptr.vmem [resolvable:$true] %s2217_s28 }
  0x62   :  { %2463 = vmatpush3.bf16.msra.mxu0 %v2657_v2  ;;  %2499 = vmatpush3.bf16.msra.mxu1 %v2670_v7  ;;  %v2668_v19 = vld [vmem:[#allocation2 + $0x20] sm:$0xff]   ;;  %v2675_v20 = vld [vmem:[#allocation7 + $0x214] ss:$44 sps:$4 sm:$0xff]   ;;  %v2685_v25 = vld [vmem:[#allocation7 + $0x64] ss:$44 sps:$4 sm:$0xff]   ;;  %v3159_v39 = vsub.s32 0, %v3156_v36  ;;  %p2984_p13 = scmp.lt.s32.totalorder %s2218_s28, %s2218_s28 }
  0x63   :  { %2464 = vmatprep.subr.bf16.mxu0 %v3020_v0  ;;  %2500 = vmatprep.subr.bf16.mxu1 %v3020_v0  ;;  %v2679_v22 = vld [vmem:[#allocation7 + $0x14] ss:$44 sps:$4 sm:$0xff]   ;;  %v2682_v24 = vld [vmem:[#allocation7 + $0xc] ss:$44 sps:$4 sm:$0xff]   ;;  %v2691_v27 = vld [vmem:[#allocation7 + $0xbc] ss:$44 sps:$4 sm:$0xff]  }
  0x64   :  { %v2680_v23 = vld [vmem:[#allocation7 + $0x8] ss:$44 sps:$4 sm:$0xff]   ;;  %v2683_v26 = vld [vmem:[#allocation7 + $0x60] ss:$44 sps:$4 sm:$0xff]   ;;  %v2689_v28 = vld [vmem:[#allocation7 + $0xb8] ss:$44 sps:$4 sm:$0xff]  }
  0x65   :  { %v2697_v29 = vld [vmem:[#allocation7 + $0x114] ss:$44 sps:$4 sm:$0xff]   ;;  %v2695_v30 = vld [vmem:[#allocation7 + $0x110] ss:$44 sps:$4 sm:$0xff]   ;;  %v2703_v31 = vld [vmem:[#allocation7 + $0x16c] ss:$44 sps:$4 sm:$0xff]  }
  0x66   :  { %2465 = vmatpush3.bf16.msra.mxu0 %v2658_v3  ;;  %2501 = vmatpush3.bf16.msra.mxu1 %v2671_v9  ;;  %v2701_v32 = vld [vmem:[#allocation7 + $0x168] ss:$44 sps:$4 sm:$0xff]   ;;  %v2709_v33 = vld [vmem:[#allocation7 + $0x1c4] ss:$44 sps:$4 sm:$0xff]   ;;  %v2707_v34 = vld [vmem:[#allocation7 + $0x1c0] ss:$44 sps:$4 sm:$0xff]  }
  0x67   :  { %2466 = vmatprep.subr.bf16.mxu0 %v3020_v0  ;;  %2502 = vmatprep.subr.bf16.mxu1 %v3020_v0  ;;  %v116_v37 = vld [vmem:[#allocation7 + $0x2c0] sm:$0x1]  ;;  %v2677_v49 = vld [vmem:[#allocation7 + $0x10] ss:$44 sps:$4 sm:$0xff]   ;;  %v2688_v51 = vld [vmem:[#allocation7 + $0x6c] ss:$44 sps:$4 sm:$0xff]  }
  0x68   :  { %v117_v38 = vunpack.c.l.bf16 %v116_v37  ;;  %v2686_v56 = vld [vmem:[#allocation7 + $0x68] ss:$44 sps:$4 sm:$0xff]   ;;  %v2694_v59 = vld [vmem:[#allocation7 + $0xc4] ss:$44 sps:$4 sm:$0xff]   ;;  %v2692_v62 = vld [vmem:[#allocation7 + $0xc0] ss:$44 sps:$4 sm:$0xff]  }
  0x69   :  { %v2700_v1 = vld [vmem:[#allocation7 + $0x11c] ss:$44 sps:$4 sm:$0xff]   ;;  %v2706_v9 = vld [vmem:[#allocation7 + $0x174] ss:$44 sps:$4 sm:$0xff]   ;;  %v2718_v37 = vld [vmem:[#allocation7 + $0x224] ss:$44 sps:$4 sm:$0xff]  }
  0x6a   :  { %2467 = vmatpush3.bf16.msra.mxu0 %v2659_v4  ;;  %2503 = vmatpush3.bf16.msra.mxu1 %v2672_v11  ;;  %v3162_v40 = vrot.slane %v117_v38, %v3159_v39  ;;  %v2713_v38 = vld [vmem:[#allocation7 + $0x218] ss:$44 sps:$4 sm:$0xff]   ;;  %vm1031_vm5 = vcmp.lt.s32.totalorder %v3156_v36, 2  ;;  %s2979_s29 = scalar_lea.vmem %s2218_s28, 768 }
  0x6b   :  { %2468 = vmatprep.subr.bf16.mxu0 %v3020_v0  ;;  %2504 = vmatprep.subr.bf16.mxu1 %v3020_v0  ;;  %p2980_p12 = scmp.ne.s32.totalorder %s2218_s28, %s2979_s29  ;;  %p2985_p0 = scmp.lt.s32.totalorder %s2979_s29, %s2979_s29 }
  0x6d   :  { %p2986_p1 = por %p2985_p0, %p2984_p13 }
  0x6e   :  { %2469 = vmatpush3.bf16.msra.mxu0 %v2660_v6  ;;  %2505 = vmatpush3.bf16.msra.mxu1 %v2673_v13  ;;  %v2698_v6 = vld [vmem:[#allocation7 + $0x118] ss:$44 sps:$4 sm:$0xff]  }
  0x6f   :  { %2470 = vmatprep.subr.bf16.mxu0 %v3020_v0  ;;  %2506 = vmatprep.subr.bf16.mxu1 %v3020_v0  ;;  %p2987_p2 = pnand %p2986_p1, %p2980_p12 }
  0x72   :  { %2471 = vmatpush3.bf16.msra.mxu0 %v2661_v8  ;;  %2507 = vmatpush3.bf16.msra.mxu1 %v2674_v15 }
  0x73   :  { %2472 = vmatprep.subr.bf16.mxu0 %v3020_v0  ;;  %2508 = vmatprep.subr.bf16.mxu1 %v3020_v0 }
  0x76   :  { %2473 = vmatpush3.bf16.msra.mxu0 %v2662_v10  ;;  %2509 = vmatpush3.bf16.msra.mxu1 %v2675_v20 }
  0x77   :  { %2474 = vmatprep.subr.bf16.mxu0 %v3020_v0  ;;  %2510 = vmatprep.subr.bf16.mxu1 %v3020_v0 }
  0x7a   :  { %2475 = vmatpush3.bf16.msra.mxu0 %v2663_v12  ;;  %2511 = vmatpush3.bf16.msra.mxu1 %v2676_v21  ;;  %v2704_v12 = vld [vmem:[#allocation7 + $0x170] ss:$44 sps:$4 sm:$0xff]  }
  0x7b   :  { %834 = vmatprep.subr.bf16.mxu1 %v2679_v22  ;;  %767 = vmatprep.subr.bf16.mxu0 %v2682_v24 }
  0x7d   :  { %2477 = vmatmul.mubr.bf16.vlgmr.msra.gmra.mrb[0].mxu0 %v2664_v14  ;;  %v2712_v14 = vld [vmem:[#allocation7 + $0x1cc] ss:$44 sps:$4 sm:$0xff]  }
  0x7e   :  { %2480 = vmatprep.mubr.msk.bf16.mxu0 %vm3021_vm0, %v3020_v0  ;;  %768 = vmatpush1.bf16.msra.mxu0 %v2680_v23 }
  0x7f   :  { %769 = vmatprep.subr.bf16.mxu0 %v2685_v25 }
  0x82   :  { %770 = vmatpush1.bf16.msra.mxu0 %v2683_v26 }
  0x83   :  { %771 = vmatprep.subr.bf16.mxu0 %v2691_v27 }
  0x85   :  { %2481 = vmatmul.mubr.bf16.gmra.mrb[4].mxu0 %v2665_v16 }
  0x86   :  { %2484 = vmatprep.mubr.msk.bf16.mxu0 %vm3021_vm0, %v3020_v0  ;;  %772 = vmatpush1.bf16.msra.mxu0 %v2689_v28 }
  0x87   :  { %773 = vmatprep.subr.bf16.mxu0 %v2697_v29 }
  0x8a   :  { %774 = vmatpush1.bf16.msra.mxu0 %v2695_v30 }
  0x8b   :  { %775 = vmatprep.subr.bf16.mxu0 %v2703_v31 }
  0x8d   :  { %2485 = vmatmul.mubr.bf16.gmra.mrb[8].mxu0 %v2666_v17 }
  0x8e   :  { %2488 = vmatprep.mubr.msk.bf16.mxu0 %vm3021_vm0, %v3020_v0  ;;  %776 = vmatpush1.bf16.msra.mxu0 %v2701_v32 }
  0x8f   :  { %777 = vmatprep.subr.bf16.mxu0 %v2709_v33 }
  0x92   :  { %778 = vmatpush1.bf16.msra.mxu0 %v2707_v34  ;;  %v2715_v34 = vld [vmem:[#allocation7 + $0x21c] ss:$44 sps:$4 sm:$0xff]  }
  0x93   :  { %779 = vmatprep.subr.bf16.mxu0 %v2715_v34 }
  0x95   :  { %2489 = vmatmul.mubr.bf16.gmra.mrb[12].mxu0 %v2667_v18 }
  0x96   :  { %2492 = vmatprep.mubr.msk.bf16.mxu0 %vm3021_vm0, %v3020_v0  ;;  %780 = vmatpush1.bf16.msra.mxu0 %v2713_v38 }
  0x9d   :  { %2493 = vmatmul.mubr.bf16.gmra.mrb[16].mxu0 %v2668_v19  ;;  %v2710_v19 = vld [vmem:[#allocation7 + $0x1c8] ss:$44 sps:$4 sm:$0xff]  }
 0x150   :  { %v234_v41 = vpop.f32.mrb[0].mxu0 }
 0x151   :  { %v235_v42 = vadd.f32 %v234_v41, %v3162_v40  ;;  %v2478_v43 = vpop.f32.mrb[1].mxu0  ;;  %v2716_v41 = vld [vmem:[#allocation7 + $0x220] ss:$44 sps:$4 sm:$0xff]  }
 0x152   :  { %v237_v44 = vpop.f32.mrb[2].mxu0  ;;  %v2724_v43 = vld [vmem:[#allocation7 + $0x27c] ss:$44 sps:$4 sm:$0xff]  }
 0x153   :  { %v238_v45 = vadd.f32 %v237_v44, %v3162_v40  ;;  %v2479_v46 = vpop.f32.mrb[3].mxu0  ;;  %v273_v47 = vmax.f32 %v235_v42, 0.0  ;;  %v2721_v42 = vld [vmem:[#allocation7 + $0x274] ss:$44 sps:$4 sm:$0xff]   ;;  %v2719_v44 = vld [vmem:[#allocation7 + $0x270] ss:$44 sps:$4 sm:$0xff]  }
 0x154   :  { %781 = vmatprep.subr.bf16.mxu0 %v2721_v42  ;;  %v2727_v46 = vld [vmem:[#allocation7 + $0x1c] ss:$44 sps:$4 sm:$0xff]  }
 0x155   :  { %v274_v48 = vmax.f32 %v238_v45, 0.0  ;;  %v2722_v45 = vld [vmem:[#allocation7 + $0x278] ss:$44 sps:$4 sm:$0xff]   ;;  %782 = vmatpush1.bf16.msra.mxu0 %v2719_v44 }
 0x156   :  { %913 = vmatprep.subr.bf16.mxu0 %v2727_v46 }
 0x157   :  { %v301_v50 = vpack.c.bf16 %v274_v48, %v273_v47  ;;  %v299_v47 = vld [vmem:[#allocation7 + $0x2c4] sm:$0x1] }
 0x158   :  { %v242_v52 = vpop.f32.mrb[4].mxu0  ;;  %v300_v48 = vunpack.c.l.bf16 %v299_v47  ;;  %v2746_v47 = vld [vmem:[#allocation7 + $0x280] ss:$44 sps:$4 sm:$0xff]  }
 0x159   :  { %v243_v53 = vadd.f32 %v242_v52, %v3162_v40  ;;  %v2482_v54 = vpop.f32.mrb[5].mxu0  ;;  %2513 = vmatmul.mubr.bf16.vlgmr.msra.gmra.mrb[0].mxu1 %v301_v50 }
 0x15a   :  { %v245_v55 = vpop.f32.mrb[6].mxu0  ;;  %2516 = vmatprep.mubr.msk.bf16.mxu1 %vm3021_vm0, %v3020_v0  ;;  %835 = vmatpush1.bf16.msra.mxu1 %v2677_v49  ;;  %v3186_v49 = vrot.slane %v300_v48, %v3159_v39 }
 0x15b   :  { %v246_v57 = vadd.f32 %v245_v55, %v3162_v40  ;;  %v2483_v58 = vpop.f32.mrb[7].mxu0  ;;  %836 = vmatprep.subr.bf16.mxu1 %v2688_v51  ;;  %v275_v60 = vmax.f32 %v243_v53, 0.0 }
 0x15d   :  { %v276_v61 = vmax.f32 %v246_v57, 0.0 }
 0x15e   :  { %837 = vmatpush1.bf16.msra.mxu1 %v2686_v56 }
 0x15f   :  { %v302_v63 = vpack.c.bf16 %v276_v61, %v275_v60  ;;  %838 = vmatprep.subr.bf16.mxu1 %v2694_v59  ;;  %v2725_v59 = vld [vmem:[#allocation7 + $0x18] ss:$44 sps:$4 sm:$0xff]   ;;  %v2730_v61 = vld [vmem:[#allocation7 + $0x74] ss:$44 sps:$4 sm:$0xff]  }
 0x160   :  { %v250_v2 = vpop.f32.mrb[8].mxu0 }
 0x161   :  { %v251_v3 = vadd.f32 %v250_v2, %v3162_v40  ;;  %v2486_v4 = vpop.f32.mrb[9].mxu0  ;;  %2517 = vmatmul.mubr.bf16.gmra.mrb[4].mxu1 %v302_v63 }
 0x162   :  { %v253_v5 = vpop.f32.mrb[10].mxu0  ;;  %2520 = vmatprep.mubr.msk.bf16.mxu1 %vm3021_vm0, %v3020_v0  ;;  %839 = vmatpush1.bf16.msra.mxu1 %v2692_v62  ;;  %v2728_v4 = vld [vmem:[#allocation7 + $0x70] ss:$44 sps:$4 sm:$0xff]  }
 0x163   :  { %v254_v7 = vadd.f32 %v253_v5, %v3162_v40  ;;  %v2487_v8 = vpop.f32.mrb[11].mxu0  ;;  %840 = vmatprep.subr.bf16.mxu1 %v2700_v1  ;;  %v277_v10 = vmax.f32 %v251_v3, 0.0  ;;  %v2733_v5 = vld [vmem:[#allocation7 + $0xcc] ss:$44 sps:$4 sm:$0xff]  }
 0x165   :  { %v278_v11 = vmax.f32 %v254_v7, 0.0 }
 0x166   :  { %841 = vmatpush1.bf16.msra.mxu1 %v2698_v6 }
 0x167   :  { %v303_v13 = vpack.c.bf16 %v278_v11, %v277_v10  ;;  %842 = vmatprep.subr.bf16.mxu1 %v2706_v9  ;;  %v2731_v9 = vld [vmem:[#allocation7 + $0xc8] ss:$44 sps:$4 sm:$0xff]   ;;  %v2736_v11 = vld [vmem:[#allocation7 + $0x124] ss:$44 sps:$4 sm:$0xff]  }
 0x168   :  { %v258_v15 = vpop.f32.mrb[12].mxu0 }
 0x169   :  { %v259_v16 = vadd.f32 %v258_v15, %v3162_v40  ;;  %v2490_v17 = vpop.f32.mrb[13].mxu0  ;;  %2521 = vmatmul.mubr.bf16.gmra.mrb[8].mxu1 %v303_v13 }
 0x16a   :  { %v261_v18 = vpop.f32.mrb[14].mxu0  ;;  %2524 = vmatprep.mubr.msk.bf16.mxu1 %vm3021_vm0, %v3020_v0  ;;  %843 = vmatpush1.bf16.msra.mxu1 %v2704_v12  ;;  %v2734_v17 = vld [vmem:[#allocation7 + $0x120] ss:$44 sps:$4 sm:$0xff]  }
 0x16b   :  { %v262_v20 = vadd.f32 %v261_v18, %v3162_v40  ;;  %v2491_v21 = vpop.f32.mrb[15].mxu0  ;;  %844 = vmatprep.subr.bf16.mxu1 %v2712_v14  ;;  %v279_v22 = vmax.f32 %v259_v16, 0.0  ;;  %v2739_v18 = vld [vmem:[#allocation7 + $0x17c] ss:$44 sps:$4 sm:$0xff]  }
 0x16d   :  { %v280_v23 = vmax.f32 %v262_v20, 0.0 }
 0x16e   :  { %845 = vmatpush1.bf16.msra.mxu1 %v2710_v19 }
 0x16f   :  { %v304_v24 = vpack.c.bf16 %v280_v23, %v279_v22  ;;  %846 = vmatprep.subr.bf16.mxu1 %v2718_v37  ;;  %v2737_v22 = vld [vmem:[#allocation7 + $0x178] ss:$44 sps:$4 sm:$0xff]   ;;  %v2743_v37 = vld [vmem:[#allocation7 + $0x228] ss:$44 sps:$4 sm:$0xff]  }
 0x170   :  { %v266_v25 = vpop.f32.mrb[16].mxu0 }
 0x171   :  { %v267_v26 = vadd.f32 %v266_v25, %v3162_v40  ;;  %v2494_v27 = vpop.f32.mrb[17].mxu0  ;;  %2525 = vmatmul.mubr.bf16.gmra.mrb[12].mxu1 %v304_v24  ;;  %v2742_v24 = vld [vmem:[#allocation7 + $0x1d4] ss:$44 sps:$4 sm:$0xff]  }
 0x172   :  { %v269_v28 = vpop.f32.mrb[18].mxu0  ;;  %2528 = vmatprep.mubr.msk.bf16.mxu1 %vm3021_vm0, %v3020_v0  ;;  %847 = vmatpush1.bf16.msra.mxu1 %v2716_v41  ;;  %v2748_v41 = vld [vmem:[#allocation7 + $0x284] ss:$44 sps:$4 sm:$0xff]  }
 0x173   :  { %v270_v29 = vadd.f32 %v269_v28, %v3162_v40  ;;  %v2495_v30 = vpop.f32.mrb[19].mxu0  ;;  %v281_v31 = vmax.f32 %v267_v26, 0.0  ;;  %848 = vmatprep.subr.bf16.mxu1 %v2724_v43  ;;  %v3022_v40 = vmov 0  }
 0x174   :  { %799 = vmatprep.mubr.bf16.mxu0 %v3022_v40  ;;  %v2740_v30 = vld [vmem:[#allocation7 + $0x1d0] ss:$44 sps:$4 sm:$0xff]  }
 0x175   :  { %v282_v32 = vmax.f32 %v270_v29, 0.0 }
 0x176   :  { %849 = vmatpush1.bf16.msra.mxu1 %v2722_v45 }
 0x177   :  { %v305_v33 = vpack.c.bf16 %v282_v32, %v281_v31  ;;  %2532 = vmatprep.subr.bf16.mxu1 %v3020_v0  ;;  %v2745_v31 = vld [vmem:[#allocation7 + $0x22c] ss:$44 sps:$4 sm:$0xff]  }
 0x179   :  { %2529 = vmatmul.mubr.bf16.gmra.mrb[16].mxu1 %v305_v33 }
 0x17a   :  { %866 = vmatprep.mubr.bf16.mxu1 %v3022_v40 }
 0x22c   :  { %v392_v50 = vpop.f32.mrb[0].mxu1 }
 0x22d   :  { %v3189_v51 = vadd.f32 %v392_v50, %v3186_v49  ;;  %v2514_v52 = vpop.f32.mrb[1].mxu1 }
 0x22e   :  { %v395_v53 = vpop.f32.mrb[2].mxu1 }
 0x22f   :  { %v3192_v54 = vadd.f32 %v395_v53, %v3186_v49  ;;  %v2515_v55 = vpop.f32.mrb[3].mxu1  ;;  %v431_v56 = vmax.f32 %v3189_v51, 0.0 }
 0x231   :  { %v432_v57 = vmax.f32 %v3192_v54, 0.0 }
 0x233   :  { %v3200_v58 = vpack.c.bf16 %v432_v57, %v431_v56 }
 0x234   :  { %v400_v60 = vpop.f32.mrb[4].mxu1 }
 0x235   :  { %v401_v62 = vadd.f32 %v400_v60, %v3186_v49  ;;  %v2518_v63 = vpop.f32.mrb[5].mxu1  ;;  %800 = vmatmul.mubr.bf16.vlgmr.msra.gmra.mrb[20].mxu0 %v3200_v58  ;;  %867 = vmatmul.mubr.bf16.vlgmr.msra.gmra.mrb[20].mxu1 %v3200_v58 }
 0x236   :  { %v403_v1 = vpop.f32.mrb[6].mxu1  ;;  %809 = vmatprep.mubr.bf16.mxu0 %v3022_v40  ;;  %872 = vmatprep.mubr.bf16.mxu1 %v3022_v40 }
 0x237   :  { %v404_v2 = vadd.f32 %v403_v1, %v3186_v49  ;;  %v2519_v3 = vpop.f32.mrb[7].mxu1  ;;  %914 = vmatpush1.bf16.msra.mxu0 %v2725_v59  ;;  %v433_v6 = vmax.f32 %v401_v62, 0.0  ;;  %v495_v59 = vld [vmem:[#allocation7 + $0x2d0] sm:$0x11] }
 0x238   :  { %915 = vmatprep.subr.bf16.mxu0 %v2730_v61 }
 0x239   :  { %v434_v7 = vmax.f32 %v404_v2, 0.0 }
 0x23b   :  { %v3208_v8 = vpack.c.bf16 %v434_v7, %v433_v6  ;;  %916 = vmatpush1.bf16.msra.mxu0 %v2728_v4  ;;  %v500_v4 = vunpack.c.h.bf16 %v495_v59 }
 0x23c   :  { %v408_v10 = vpop.f32.mrb[8].mxu1  ;;  %917 = vmatprep.subr.bf16.mxu0 %v2733_v5 }
 0x23d   :  { %v409_v12 = vadd.f32 %v408_v10, %v3186_v49  ;;  %v2522_v13 = vpop.f32.mrb[9].mxu1  ;;  %810 = vmatmul.mubr.bf16.gmra.mrb[24].mxu0 %v3208_v8  ;;  %873 = vmatmul.mubr.bf16.gmra.mrb[24].mxu1 %v3208_v8 }
 0x23e   :  { %v411_v14 = vpop.f32.mrb[10].mxu1  ;;  %815 = vmatprep.mubr.bf16.mxu0 %v3022_v40  ;;  %882 = vmatprep.mubr.bf16.mxu1 %v3022_v40 }
 0x23f   :  { %v412_v15 = vadd.f32 %v411_v14, %v3186_v49  ;;  %v2523_v16 = vpop.f32.mrb[11].mxu1  ;;  %918 = vmatpush1.bf16.msra.mxu0 %v2731_v9  ;;  %v435_v19 = vmax.f32 %v409_v12, 0.0  ;;  %v499_v9 = vunpack.c.l.bf16 %v495_v59  ;;  %v3243_v14 = vrot.slane %v500_v4, %v3159_v39 }
 0x240   :  { %919 = vmatprep.subr.bf16.mxu0 %v2736_v11 }
 0x241   :  { %v436_v20 = vmax.f32 %v412_v15, 0.0  ;;  %v3246_v15 = vrot.slane %v499_v9, %v3159_v39 }
 0x243   :  { %v443_v21 = vpack.c.bf16 %v436_v20, %v435_v19  ;;  %920 = vmatpush1.bf16.msra.mxu0 %v2734_v17 }
 0x244   :  { %v416_v23 = vpop.f32.mrb[12].mxu1  ;;  %921 = vmatprep.subr.bf16.mxu0 %v2739_v18 }
 0x245   :  { %v417_v25 = vadd.f32 %v416_v23, %v3186_v49  ;;  %v2526_v26 = vpop.f32.mrb[13].mxu1  ;;  %816 = vmatmul.mubr.bf16.gmra.mrb[28].mxu0 %v443_v21  ;;  %883 = vmatmul.mubr.bf16.gmra.mrb[28].mxu1 %v443_v21 }
 0x246   :  { %v419_v27 = vpop.f32.mrb[14].mxu1  ;;  %821 = vmatprep.mubr.bf16.mxu0 %v3022_v40  ;;  %892 = vmatprep.mubr.bf16.mxu1 %v3022_v40 }
 0x247   :  { %v420_v28 = vadd.f32 %v419_v27, %v3186_v49  ;;  %v2527_v29 = vpop.f32.mrb[15].mxu1  ;;  %922 = vmatpush1.bf16.msra.mxu0 %v2737_v22  ;;  %v437_v32 = vmax.f32 %v417_v25, 0.0 }
 0x248   :  { %923 = vmatprep.subr.bf16.mxu0 %v2742_v24 }
 0x249   :  { %v438_v33 = vmax.f32 %v420_v28, 0.0 }
 0x24b   :  { %v444_v34 = vpack.c.bf16 %v438_v33, %v437_v32  ;;  %924 = vmatpush1.bf16.msra.mxu0 %v2740_v30 }
 0x24c   :  { %v424_v38 = vpop.f32.mrb[16].mxu1  ;;  %925 = vmatprep.subr.bf16.mxu0 %v2745_v31 }
 0x24d   :  { %v425_v42 = vadd.f32 %v424_v38, %v3186_v49  ;;  %v2530_v43 = vpop.f32.mrb[17].mxu1  ;;  %822 = vmatmul.mubr.bf16.gmra.mrb[32].mxu0 %v444_v34  ;;  %893 = vmatmul.mubr.bf16.gmra.mrb[32].mxu1 %v444_v34 }
 0x24e   :  { %v427_v44 = vpop.f32.mrb[18].mxu1  ;;  %827 = vmatprep.mubr.bf16.mxu0 %v3022_v40  ;;  %902 = vmatprep.mubr.bf16.mxu1 %v3022_v40 }
 0x24f   :  { %v428_v45 = vadd.f32 %v427_v44, %v3186_v49  ;;  %v2531_v46 = vpop.f32.mrb[19].mxu1  ;;  %926 = vmatpush1.bf16.msra.mxu0 %v2743_v37  ;;  %v439_v48 = vmax.f32 %v425_v42, 0.0  ;;  %v494_v49 = vld [vmem:[#allocation7 + $0x2c8] sm:$0x11] }
 0x250   :  { %927 = vmatprep.subr.bf16.mxu0 %v2748_v41  ;;  %v497_v53 = vunpack.c.l.bf16 %v494_v49  ;;  %v498_v55 = vunpack.c.h.bf16 %v494_v49 }
 0x251   :  { %v440_v50 = vmax.f32 %v428_v45, 0.0 }
 0x252   :  { %v510_v62 = vrot.slane %v498_v55, %v3159_v39 }
 0x253   :  { %v445_v52 = vpack.c.bf16 %v440_v50, %v439_v48  ;;  %928 = vmatpush1.bf16.msra.mxu0 %v2746_v47 }
 0x254   :  { %2556 = vmatprep.subr.bf16.mxu0 %v3020_v0 }
 0x255   :  { %828 = vmatmul.mubr.bf16.gmra.mrb[36].mxu0 %v445_v52  ;;  %903 = vmatmul.mubr.bf16.gmra.mrb[36].mxu1 %v445_v52 }
 0x256   :  { %945 = vmatprep.mubr.bf16.mxu0 %v3022_v40  ;;  %2540 = vmatprep.mubr.msk.bf16.mxu1 %vm3021_vm0, %v3020_v0 }
 0x25d   :  { %946 = vmatmul.mubr.bf16.vlgmr.msra.gmra.mrb[40].mxu0 %v3200_v58  ;;  %v506_v58 = vrot.slane %v497_v53, %v3159_v39 }
 0x25e   :  { %951 = vmatprep.mubr.bf16.mxu0 %v3022_v40 }
 0x265   :  { %952 = vmatmul.mubr.bf16.gmra.mrb[44].mxu0 %v3208_v8 }
 0x266   :  { %961 = vmatprep.mubr.bf16.mxu0 %v3022_v40 }
 0x26d   :  { %962 = vmatmul.mubr.bf16.gmra.mrb[48].mxu0 %v443_v21 }
 0x26e   :  { %971 = vmatprep.mubr.bf16.mxu0 %v3022_v40 }
 0x275   :  { %972 = vmatmul.mubr.bf16.gmra.mrb[52].mxu0 %v444_v34 }
 0x276   :  { %981 = vmatprep.mubr.bf16.mxu0 %v3022_v40 }
 0x27d   :  { %982 = vmatmul.mubr.bf16.gmra.mrb[56].mxu0 %v445_v52 }
 0x27e   :  { %2564 = vmatprep.mubr.msk.bf16.mxu0 %vm3021_vm0, %v3020_v0 }
 0x308   :  { %v801_v60 = vpop.f32.mrb[20].mxu0  ;;  %v868_v61 = vpop.f32.mrb[20].mxu1 }
 0x309   :  { %v803_v63 = vpop.f32.mrb[21].mxu0  ;;  %v869_v1 = vpop.f32.mrb[21].mxu1  ;;  %v802_v5 = vadd.f32 %v801_v60, %v506_v58 }
 0x30a   :  { %v805_v2 = vpop.f32.mrb[22].mxu0  ;;  %v870_v3 = vpop.f32.mrb[22].mxu1  ;;  %v804_v10 = vadd.f32 %v803_v63, %v510_v62 }
 0x30b   :  { %v806_v6 = vadd.f32 %v805_v2, %v506_v58  ;;  %v807_v7 = vpop.f32.mrb[23].mxu0  ;;  %v871_v8 = vpop.f32.mrb[23].mxu1 }
 0x30c   :  { %v808_v11 = vadd.f32 %v807_v7, %v510_v62 }
 0x30d   :  { %v3238_v12 = vpack.c.bf16 %v806_v6, %v802_v5 }
 0x30e   :  { %v3240_v13 = vpack.c.bf16 %v808_v11, %v804_v10 }
 0x310   :  { %v811_v16 = vpop.f32.mrb[24].mxu0  ;;  %v874_v17 = vpop.f32.mrb[24].mxu1 }
 0x311   :  { %v812_v18 = vpop.f32.mrb[25].mxu0  ;;  %v876_v19 = vpop.f32.mrb[25].mxu1  ;;  %v875_v23 = vadd.f32 %v874_v17, %v3246_v15 }
 0x312   :  { %v877_v20 = vadd.f32 %v876_v19, %v3243_v14  ;;  %v813_v21 = vpop.f32.mrb[26].mxu0  ;;  %v878_v22 = vpop.f32.mrb[26].mxu1 }
 0x313   :  { %v879_v24 = vadd.f32 %v878_v22, %v3246_v15  ;;  %v814_v25 = vpop.f32.mrb[27].mxu0  ;;  %v880_v26 = vpop.f32.mrb[27].mxu1 }
 0x314   :  { %v881_v27 = vadd.f32 %v880_v26, %v3243_v14  ;;  %v496_v25 = vld [vmem:[#allocation7 + $0x2d8] sm:$0x11] }
 0x315   :  { %v994_v28 = vpack.c.bf16 %v879_v24, %v875_v23 }
 0x316   :  { %v3252_v29 = vpack.c.bf16 %v881_v27, %v877_v20 }
 0x317   :  { %1168 = vrot.lane.b32.xlu0 %v994_v28, %s3014_s18  ;;  %v1042_v30 = vsel %vm1037_vm1, %v994_v28, 0 }
 0x318   :  { %v817_v31 = vpop.f32.mrb[28].mxu0  ;;  %v884_v32 = vpop.f32.mrb[28].mxu1  ;;  %2533 = vmatpush3.bf16.xpose.msra.mxu1 %v1042_v30  ;;  %v502_v30 = vunpack.c.h.bf16 %v496_v25 }
 0x319   :  { %v818_v33 = vpop.f32.mrb[29].mxu0  ;;  %v886_v34 = vpop.f32.mrb[29].mxu1  ;;  %2534 = vmatprep.subr.bf16.mxu1 %v3020_v0  ;;  %v885_v42 = vadd.f32 %v884_v32, %v3246_v15  ;;  %v501_v31 = vunpack.c.l.bf16 %v496_v25 }
 0x31a   :  { %v887_v37 = vadd.f32 %v886_v34, %v3243_v14  ;;  %v819_v38 = vpop.f32.mrb[30].mxu0  ;;  %v888_v41 = vpop.f32.mrb[30].mxu1  ;;  %v526_v32 = vrot.slane %v502_v30, %v3159_v39 }
 0x31b   :  { %v889_v43 = vadd.f32 %v888_v41, %v3246_v15  ;;  %v820_v44 = vpop.f32.mrb[31].mxu0  ;;  %v890_v45 = vpop.f32.mrb[31].mxu1 }
 0x31c   :  { %v891_v46 = vadd.f32 %v890_v45, %v3243_v14 }
 0x31d   :  { %v998_v47 = vpack.c.bf16 %v889_v43, %v885_v42 }
 0x31e   :  { %v3261_v48 = vpack.c.bf16 %v891_v46, %v887_v37 }
 0x31f   :  { %1170 = vrot.lane.b32.xlu0 %v998_v47, %s3014_s18  ;;  %v1045_v50 = vsel %vm1037_vm1, %v998_v47, 0 }
 0x320   :  { %v823_v52 = vpop.f32.mrb[32].mxu0  ;;  %v894_v49 = vpop.f32.mrb[32].mxu1  ;;  %2535 = vmatpush3.bf16.xpose.msra.mxu1 %v1045_v50 }
 0x321   :  { %v824_v53 = vpop.f32.mrb[33].mxu0  ;;  %v896_v55 = vpop.f32.mrb[33].mxu1  ;;  %2536 = vmatprep.subr.bf16.mxu1 %v3020_v0  ;;  %v895_v61 = vadd.f32 %v894_v49, %v3246_v15 }
 0x322   :  { %v897_v58 = vadd.f32 %v896_v55, %v3243_v14  ;;  %v825_v59 = vpop.f32.mrb[34].mxu0  ;;  %v898_v60 = vpop.f32.mrb[34].mxu1 }
 0x323   :  { %v899_v62 = vadd.f32 %v898_v60, %v3246_v15  ;;  %v826_v63 = vpop.f32.mrb[35].mxu0  ;;  %v900_v1 = vpop.f32.mrb[35].mxu1  ;;  %1162 = vrot.lane.b32.xlu0 %v3238_v12, %s3014_s18 }
 0x324   :  { %v901_v2 = vadd.f32 %v900_v1, %v3243_v14 }
 0x325   :  { %v1002_v3 = vpack.c.bf16 %v899_v62, %v895_v61 }
 0x326   :  { %v3272_v4 = vpack.c.bf16 %v901_v2, %v897_v58 }
 0x327   :  { %1172 = vrot.lane.b32.xlu1 %v1002_v3, %s3014_s18  ;;  %v1048_v5 = vsel %vm1037_vm1, %v1002_v3, 0 }
 0x328   :  { %v829_v6 = vpop.f32.mrb[36].mxu0  ;;  %v904_v7 = vpop.f32.mrb[36].mxu1  ;;  %2537 = vmatpush3.bf16.xpose.msra.mxu1 %v1048_v5 }
 0x329   :  { %v830_v8 = vpop.f32.mrb[37].mxu0  ;;  %v906_v9 = vpop.f32.mrb[37].mxu1  ;;  %2538 = vmatprep.subr.bf16.mxu1 %v3020_v0  ;;  %v905_v17 = vadd.f32 %v904_v7, %v3246_v15 }
 0x32a   :  { %v907_v10 = vadd.f32 %v906_v9, %v3243_v14  ;;  %v831_v11 = vpop.f32.mrb[38].mxu0  ;;  %v908_v16 = vpop.f32.mrb[38].mxu1 }
 0x32b   :  { %v909_v18 = vadd.f32 %v908_v16, %v3246_v15  ;;  %v832_v19 = vpop.f32.mrb[39].mxu0  ;;  %v910_v20 = vpop.f32.mrb[39].mxu1 }
 0x32c   :  { %v911_v21 = vadd.f32 %v910_v20, %v3243_v14  ;;  %v522_v14 = vrot.slane %v501_v31, %v3159_v39 }
 0x32d   :  { %v1006_v22 = vpack.c.bf16 %v909_v18, %v905_v17 }
 0x32e   :  { %v3281_v23 = vpack.c.bf16 %v911_v21, %v907_v10 }
 0x32f   :  { %1174 = vrot.lane.b32.xlu1 %v1006_v22, %s3014_s18  ;;  %v1051_v24 = vsel %vm1037_vm1, %v1006_v22, 0 }
 0x330   :  { %v947_v26 = vpop.f32.mrb[40].mxu0  ;;  %2539 = vmatpush3.bf16.xpose.msra.mxu1 %v1051_v24 }
 0x331   :  { %v948_v27 = vpop.f32.mrb[41].mxu0  ;;  %2544 = vmatprep.subr.bf16.mxu1 %v3020_v0 }
 0x332   :  { %v949_v28 = vpop.f32.mrb[42].mxu0 }
 0x333   :  { %v950_v15 = vpop.f32.mrb[43].mxu0 }
 0x337   :  { %2541 = vmatmul.mubr.msk.bf16.vlgmr.msra.gmra.mrb[40].mxu1 %vm1037_vm1, %v3238_v12 }
 0x338   :  { %v953_v33 = vpop.f32.mrb[44].mxu0  ;;  %2552 = vmatprep.mubr.msk.bf16.mxu1 %vm3021_vm0, %v3020_v0 }
 0x339   :  { %v955_v34 = vpop.f32.mrb[45].mxu0  ;;  %v954_v41 = vadd.f32 %v953_v33, %v522_v14  ;;  %v1322_v33 = vsel %vm1037_vm1, %v3261_v48, 0 }
 0x33a   :  { %v956_v37 = vadd.f32 %v955_v34, %v526_v32  ;;  %v957_v38 = vpop.f32.mrb[46].mxu0  ;;  %v1325_v34 = vsel %vm1037_vm1, %v3272_v4, 0 }
 0x33b   :  { %v958_v42 = vadd.f32 %v957_v38, %v522_v14  ;;  %v959_v43 = vpop.f32.mrb[47].mxu0 }
 0x33c   :  { %v960_v44 = vadd.f32 %v959_v43, %v526_v32 }
 0x33d   :  { %v3292_v45 = vpack.c.bf16 %v958_v42, %v954_v41 }
 0x33e   :  { %v3294_v46 = vpack.c.bf16 %v960_v44, %v956_v37  ;;  %v1328_v37 = vsel %vm1037_vm1, %v3281_v23, 0 }
 0x33f   :  { %2545 = vmatpush3.bf16.msra.mxu1 %v3292_v45 }
 0x340   :  { %v963_v12 = vpop.f32.mrb[48].mxu0  ;;  %2546 = vmatprep.subr.bf16.mxu1 %v3020_v0 }
 0x341   :  { %v965_v47 = vpop.f32.mrb[49].mxu0  ;;  %v964_v49 = vadd.f32 %v963_v12, %v522_v14 }
 0x342   :  { %v966_v50 = vadd.f32 %v965_v47, %v526_v32  ;;  %v967_v52 = vpop.f32.mrb[50].mxu0 }
 0x343   :  { %v968_v53 = vadd.f32 %v967_v52, %v522_v14  ;;  %v969_v55 = vpop.f32.mrb[51].mxu0  ;;  %v1023_v52 = vadd.s32 1, %v3156_v36 }
 0x344   :  { %v970_v58 = vadd.f32 %v969_v55, %v526_v32 }
 0x345   :  { %v3298_v59 = vpack.c.bf16 %v968_v53, %v964_v49  ;;  %v1014_v49 = vand.u32 127, %v118_v35  ;;  %v1019_v53 = vmul.u32 4, %v3156_v36  ;;  %v1025_v55 = vmul.u32 4, %v1023_v52 }
 0x346   :  { %v3300_v60 = vpack.c.bf16 %v970_v58, %v966_v50  ;;  %v3023_v58 = vmov -1e+09  }
 0x347   :  { %2547 = vmatpush3.bf16.msra.mxu1 %v3298_v59  ;;  %vm1021_vm2 = vcmp.ge.s32.totalorder %v1014_v49, %v1019_v53  ;;  %vm1027_vm3 = vcmp.lt.s32.totalorder %v1014_v49, %v1025_v55 }
 0x348   :  { %v973_v61 = vpop.f32.mrb[52].mxu0  ;;  %2548 = vmatprep.subr.bf16.mxu1 %v3020_v0  ;;  %vm1029_vm4 = vmand %vm1021_vm2, %vm1027_vm3 }
 0x349   :  { %v975_v62 = vpop.f32.mrb[53].mxu0  ;;  %v974_v2 = vadd.f32 %v973_v61, %v522_v14  ;;  %vm1033_vm6 = vmand %vm1029_vm4, %vm1031_vm5 }
 0x34a   :  { %v976_v63 = vadd.f32 %v975_v62, %v526_v32  ;;  %v977_v1 = vpop.f32.mrb[54].mxu0  ;;  %v3355_v61 = vsel %vm1033_vm6, 0.0, %v3023_v58 }
 0x34b   :  { %v978_v3 = vadd.f32 %v977_v1, %v522_v14  ;;  %v979_v5 = vpop.f32.mrb[55].mxu0 }
 0x34c   :  { %v980_v6 = vadd.f32 %v979_v5, %v526_v32 }
 0x34d   :  { %v3304_v7 = vpack.c.bf16 %v978_v3, %v974_v2 }
 0x34e   :  { %v3306_v8 = vpack.c.bf16 %v980_v6, %v976_v63 }
 0x34f   :  { %2549 = vmatpush3.bf16.msra.mxu1 %v3304_v7 }
 0x350   :  { %v983_v9 = vpop.f32.mrb[56].mxu0  ;;  %2550 = vmatprep.subr.bf16.mxu1 %v3020_v0 }
 0x351   :  { %v985_v10 = vpop.f32.mrb[57].mxu0  ;;  %v984_v17 = vadd.f32 %v983_v9, %v522_v14 }
 0x352   :  { %v986_v11 = vadd.f32 %v985_v10, %v526_v32  ;;  %v987_v16 = vpop.f32.mrb[58].mxu0 }
 0x353   :  { %v988_v18 = vadd.f32 %v987_v16, %v522_v14  ;;  %v989_v19 = vpop.f32.mrb[59].mxu0  ;;  %v1319_v14 = vsel %vm1037_vm1, %v3252_v29, 0 }
 0x354   :  { %v990_v20 = vadd.f32 %v989_v19, %v526_v32 }
 0x355   :  { %v3310_v21 = vpack.c.bf16 %v988_v18, %v984_v17 }
 0x356   :  { %v3312_v22 = vpack.c.bf16 %v990_v20, %v986_v11 }
 0x357   :  { %2551 = vmatpush3.bf16.msra.mxu1 %v3310_v21 }
 0x358   :  { %2568 = vmatprep.subr.bf16.mxu1 %v3020_v0 }
 0x389   :  { %v1169_v24 = vpop.permute.xlu0 %1168 }
 0x38a   :  { %v1180_v25 = vsel %vm1037_vm1, %v1169_v24, 0 }
 0x38b   :  { %2557 = vmatpush3.bf16.xpose.msra.mxu0 %v1180_v25 }
 0x38c   :  { %2558 = vmatprep.subr.bf16.mxu0 %v3020_v0 }
 0x391   :  { %v1171_v26 = vpop.permute.xlu0 %1170 }
 0x392   :  { %v1183_v27 = vsel %vm1037_vm1, %v1171_v26, 0 }
 0x393   :  { %2559 = vmatpush3.bf16.xpose.msra.mxu0 %v1183_v27 }
 0x394   :  { %2560 = vmatprep.subr.bf16.mxu0 %v3020_v0 }
 0x395   :  { %v1163_v32 = vpop.permute.xlu0 %1162 }
 0x399   :  { %v1173_v28 = vpop.permute.xlu1 %1172 }
 0x39a   :  { %v1186_v30 = vsel %vm1037_vm1, %v1173_v28, 0 }
 0x39b   :  { %2561 = vmatpush3.bf16.xpose.msra.mxu0 %v1186_v30 }
 0x39c   :  { %2562 = vmatprep.subr.bf16.mxu0 %v3020_v0 }
 0x3a1   :  { %v1175_v15 = vpop.permute.xlu1 %1174 }
 0x3a2   :  { %v1189_v31 = vsel %vm1037_vm1, %v1175_v15, 0 }
 0x3a3   :  { %2563 = vmatpush3.bf16.xpose.msra.mxu0 %v1189_v31 }
 0x3a4   :  { %2580 = vmatprep.subr.bf16.mxu0 %v3020_v0 }
 0x3aa   :  { %2565 = vmatmul.mubr.msk.bf16.vlgmr.msra.gmra.mrb[60].mxu0 %vm1037_vm1, %v1163_v32 }
 0x3ab   :  { %2581 = vmatpush3.bf16.xpose.msra.mxu0 %v1319_v14  ;;  %2588 = vmatprep.mubr.msk.bf16.mxu0 %vm3021_vm0, %v3020_v0 }
 0x3ac   :  { %2582 = vmatprep.subr.bf16.mxu0 %v3020_v0 }
 0x3b3   :  { %2583 = vmatpush3.bf16.xpose.msra.mxu0 %v1322_v33 }
 0x3b4   :  { %2584 = vmatprep.subr.bf16.mxu0 %v3020_v0 }
 0x3bb   :  { %2585 = vmatpush3.bf16.xpose.msra.mxu0 %v1325_v34 }
 0x3bc   :  { %2586 = vmatprep.subr.bf16.mxu0 %v3020_v0 }
 0x3c3   :  { %2587 = vmatpush3.bf16.xpose.msra.mxu0 %v1328_v37 }
 0x3c4   :  { %2592 = vmatprep.subr.bf16.mxu0 %v3020_v0 }
 0x3ca   :  { %2589 = vmatmul.mubr.msk.bf16.vlgmr.msra.gmra.mrb[64].mxu0 %vm1037_vm1, %v3240_v13 }
 0x3cb   :  { %2593 = vmatpush3.bf16.msra.mxu0 %v3294_v46  ;;  %2600 = vmatprep.mubr.msk.bf16.mxu0 %vm3021_vm0, %v3020_v0 }
 0x3cc   :  { %2594 = vmatprep.subr.bf16.mxu0 %v3020_v0 }
 0x3cf   :  { %2595 = vmatpush3.bf16.msra.mxu0 %v3300_v60 }
 0x3d0   :  { %2596 = vmatprep.subr.bf16.mxu0 %v3020_v0 }
 0x3d3   :  { %2597 = vmatpush3.bf16.msra.mxu0 %v3306_v8 }
 0x3d4   :  { %2598 = vmatprep.subr.bf16.mxu0 %v3020_v0 }
 0x3d7   :  { %2599 = vmatpush3.bf16.msra.mxu0 %v3312_v22 }
 0x3d8   :  { %2604 = vmatprep.subr.bf16.mxu0 %v3020_v0 }
 0x40a   :  { %v1087_v38 = vpop.f32.mrb[40].mxu1 }
 0x40b   :  { %v2542_v41 = vpop.f32.mrb[41].mxu1  ;;  %v1088_v25 = vadd.f32 %v1087_v38, %v3355_v61 }
 0x40c   :  { %v1090_v42 = vpop.f32.mrb[42].mxu1 }
 0x40d   :  { %v2543_v43 = vpop.f32.mrb[43].mxu1  ;;  %v1094_v27 = vsel %vm1037_vm1, %v1088_v25, -inf }
 0x47d   :  { %v1225_v44 = vpop.f32.mrb[60].mxu0 }
 0x47e   :  { %v2566_v12 = vpop.f32.mrb[61].mxu0  ;;  %v1226_v26 = vadd.f32 %v1225_v44, %v3355_v61 }
 0x47f   :  { %v1228_v47 = vpop.f32.mrb[62].mxu0 }
 0x480   :  { %v2567_v50 = vpop.f32.mrb[63].mxu0  ;;  %v1229_v28 = vadd.f32 -1e+09, %v1228_v47 }
 0x49d   :  { %v1364_v62 = vpop.f32.mrb[64].mxu0 }
 0x49e   :  { %v1365_v63 = vadd.f32 %v1364_v62, %v3355_v61  ;;  %v2590_v1 = vpop.f32.mrb[65].mxu0 }
 0x49f   :  { %v1367_v2 = vpop.f32.mrb[66].mxu0 }
 0x4a0   :  { %v1368_v3 = vadd.f32 -1e+09, %v1367_v2  ;;  %v2591_v5 = vpop.f32.mrb[67].mxu0  ;;  %v1371_v35 = vsel %vm1037_vm1, %v1365_v63, -inf }
 0x4a1   :  { %1372 = vmax.xlane.f32.xlu1 %v1371_v35 }
 0x4a2   :  { %v1374_v6 = vsel %vm1037_vm1, %v1368_v3, -inf }
 0x4a3   :  { %1375 = vmax.xlane.f32.xlu0 %v1374_v6 }
 0x52e   :  { %v1373_v9 = vpop.xlane.xlu1 %1372 }
 0x52f   :  { %v1377_v10 = vsub.f32 %v1365_v63, %v1373_v9 }
 0x530   :  { %v1376_v36 = vpop.xlane.xlu0 %1375 }
 0x531   :  { %v1379_v11 = vmul.f32 1.442695, %v1377_v10  ;;  %v1378_v16 = vsub.f32 %v1368_v3, %v1376_v36 }
 0x533   :  { %2837 = vpow2.f32 %v1379_v11  ;;  %v1381_v17 = vmul.f32 1.442695, %v1378_v16 }
 0x535   :  { %2839 = vpow2.f32 %v1381_v17 }
 0x53d   :  { %v2838_v18 = vpop.eup %2837 }
 0x53e   :  { %v1383_v19 = vsel %vm1037_vm1, %v2838_v18, 0.0 }
 0x53f   :  { %v2840_v20 = vpop.eup %2839  ;;  %1384 = vadd.xlane.f32.xlu0 %v1383_v19 }
 0x540   :  { %v1386_v24 = vsel %vm1037_vm1, %v2840_v20, 0.0 }
 0x541   :  { %1387 = vadd.xlane.f32.xlu1 %v1386_v24 }
 0x552   :  { %1447 = vrot.lane.b32.xlu1 %v3261_v48, %s3014_s18  ;;  %v1091_v48 = vadd.f32 -1e+09, %v1090_v42 }
 0x555   :  { %1445 = vrot.lane.b32.xlu0 %v3252_v29, %s3014_s18  ;;  %v1232_v29 = vsel %vm1037_vm1, %v1226_v26, -inf }
 0x556   :  { %1449 = vrot.lane.b32.xlu1 %v3272_v4, %s3014_s18  ;;  %v1097_v4 = vsel %vm1037_vm1, %v1091_v48, -inf }
 0x559   :  { %1451 = vrot.lane.b32.xlu0 %v3281_v23, %s3014_s18  ;;  %v1235_v23 = vsel %vm1037_vm1, %v1229_v28, -inf }
 0x55a   :  { %1439 = vrot.lane.b32.xlu1 %v3240_v13, %s3014_s18 }
 0x578   :  { %1095 = vmax.xlane.f32.xlu0 %v1094_v27 }
 0x57c   :  { %1233 = vmax.xlane.f32.xlu0 %v1232_v29 }
 0x57e   :  { %1098 = vmax.xlane.f32.xlu1 %v1097_v4 }
 0x580   :  { %1236 = vmax.xlane.f32.xlu0 %v1235_v23 }
 0x5cc   :  { %v1385_v30 = vpop.xlane.xlu0 %1384 }
 0x5cd   :  { %2841 = vrcp.f32 %v1385_v30 }
 0x5ce   :  { %v1388_v13 = vpop.xlane.xlu1 %1387 }
 0x5cf   :  { %2843 = vrcp.f32 %v1388_v13 }
 0x5d0   :  { %v1446_v33 = vpop.permute.xlu0 %1445 }
 0x5d1   :  { %v1457_v37 = vsel %vm1037_vm1, %v1446_v33, 0 }
 0x5d2   :  { %v1448_v38 = vpop.permute.xlu1 %1447 }
 0x5d3   :  { %v1460_v41 = vsel %vm1037_vm1, %v1448_v38, 0 }
 0x5d4   :  { %v1452_v44 = vpop.permute.xlu0 %1451 }
 0x5d5   :  { %v1466_v12 = vsel %vm1037_vm1, %v1452_v44, 0 }
 0x5d6   :  { %v1450_v42 = vpop.permute.xlu1 %1449 }
 0x5d7   :  { %v2842_v15 = vpop.eup %2841  ;;  %v1463_v43 = vsel %vm1037_vm1, %v1450_v42, 0 }
 0x5d8   :  { %v1391_v32 = vmul.f32 %v2842_v15, %v2838_v18 }
 0x5d9   :  { %v2844_v31 = vpop.eup %2843 }
 0x5da   :  { %v1392_v14 = vmul.f32 %v2844_v31, %v2840_v20  ;;  %v1440_v47 = vpop.permute.xlu1 %1439 }
 0x5dc   :  { %v1393_v34 = vpack.c.bf16 %v1392_v14, %v1391_v32 }
 0x5de   :  { %2601 = vmatmul.mubr.msk.bf16.vlgmr.msra.gmra.mrb[68].mxu0 %vm1037_vm1, %v1393_v34 }
 0x5df   :  { %2605 = vmatpush3.bf16.xpose.msra.mxu0 %v1457_v37  ;;  %2612 = vmatprep.mubr.msk.bf16.mxu0 %vm3021_vm0, %v3020_v0 }
 0x5e0   :  { %2606 = vmatprep.subr.bf16.mxu0 %v3020_v0 }
 0x5e7   :  { %2607 = vmatpush3.bf16.xpose.msra.mxu0 %v1460_v41 }
 0x5e8   :  { %2608 = vmatprep.subr.bf16.mxu0 %v3020_v0 }
 0x5ef   :  { %2609 = vmatpush3.bf16.xpose.msra.mxu0 %v1463_v43 }
 0x5f0   :  { %2610 = vmatprep.subr.bf16.mxu0 %v3020_v0 }
 0x5f7   :  { %2611 = vmatpush3.bf16.xpose.msra.mxu0 %v1466_v12 }
 0x5fe   :  { %2613 = vmatmul.mubr.msk.bf16.vlgmr.msra.gmra.mrb[72].mxu0 %vm1037_vm1, %v1440_v47 }
 0x5ff   :  { %1931 = vmatprep.mubr.bf16.mxu0 %v3022_v40 }
 0x605   :  { %v1096_v55 = vpop.xlane.xlu0 %1095 }
 0x606   :  { %v1100_v63 = vsub.f32 %v1088_v25, %v1096_v55 }
 0x608   :  { %v1102_v3 = vmul.f32 1.442695, %v1100_v63 }
 0x609   :  { %v1234_v58 = vpop.xlane.xlu0 %1233 }
 0x60a   :  { %v1238_v5 = vsub.f32 %v1226_v26, %v1234_v58  ;;  %2845 = vpow2.f32 %v1102_v3 }
 0x60b   :  { %v1099_v62 = vpop.xlane.xlu1 %1098 }
 0x60c   :  { %v1101_v1 = vsub.f32 %v1091_v48, %v1099_v62  ;;  %v1240_v9 = vmul.f32 1.442695, %v1238_v5 }
 0x60d   :  { %v1237_v2 = vpop.xlane.xlu0 %1236 }
 0x60e   :  { %v1104_v35 = vmul.f32 1.442695, %v1101_v1  ;;  %v1239_v6 = vsub.f32 %v1229_v28, %v1237_v2 }
 0x610   :  { %2847 = vpow2.f32 %v1104_v35  ;;  %v1242_v40 = vmul.f32 1.442695, %v1239_v6 }
 0x611   :  { %2849 = vpow2.f32 %v1240_v9 }
 0x612   :  { %2851 = vpow2.f32 %v1242_v40 }
 0x614   :  { %v2846_v20 = vpop.eup %2845 }
 0x615   :  { %v1106_v26 = vsel %vm1037_vm1, %v2846_v20, 0.0 }
 0x61a   :  { %v2848_v25 = vpop.eup %2847 }
 0x61b   :  { %v2850_v27 = vpop.eup %2849  ;;  %v1109_v48 = vsel %vm1037_vm1, %v2848_v25, 0.0 }
 0x61c   :  { %v2852_v28 = vpop.eup %2851 }
 0x61d   :  { %v1247_v29 = vsel %vm1037_vm1, %v2852_v28, 0.0 }
 0x6b1   :  { %v3390_v50 = vpop.f32.mrb[68].mxu0 }
 0x6b2   :  { %v2602_v52 = vpop.f32.mrb[69].mxu0 }
 0x6b3   :  { %v3392_v49 = vpop.f32.mrb[70].mxu0 }
 0x6b4   :  { %v2603_v53 = vpop.f32.mrb[71].mxu0 }
 0x6d1   :  { %v1502_v10 = vpop.f32.mrb[72].mxu0 }
 0x6d2   :  { %v1503_v36 = vadd.f32 %v1502_v10, %v3355_v61  ;;  %v2614_v11 = vpop.f32.mrb[73].mxu0  ;;  %v1244_v61 = vsel %vm1037_vm1, %v2850_v27, 0.0 }
 0x6d3   :  { %v1505_v16 = vpop.f32.mrb[74].mxu0 }
 0x6d4   :  { %v1506_v17 = vadd.f32 -1e+09, %v1505_v16  ;;  %v2615_v18 = vpop.f32.mrb[75].mxu0  ;;  %v1509_v19 = vsel %vm1037_vm1, %v1503_v36, -inf }
 0x6d5   :  { %1510 = vmax.xlane.f32.xlu1 %v1509_v19 }
 0x6d6   :  { %v1512_v24 = vsel %vm1037_vm1, %v1506_v17, -inf }
 0x6d7   :  { %1513 = vmax.xlane.f32.xlu0 %v1512_v24  ;;  %v2750_v24 = vld [vmem:[#allocation8] sm:$0xff]  }
 0x6d9   :  { %1107 = vadd.xlane.f32.xlu1 %v1106_v26  ;;  %v2752_v26 = vld [vmem:[#allocation8 + $0x8] sm:$0xff]  }
 0x6db   :  { %1110 = vadd.xlane.f32.xlu0 %v1109_v48  ;;  %v2754_v48 = vld [vmem:[#allocation8 + $0x10] sm:$0xff]  }
 0x6dd   :  { %1245 = vadd.xlane.f32.xlu1 %v1244_v61  ;;  %v2756_v61 = vld [vmem:[#allocation8 + $0x18] sm:$0xff]  }
 0x6df   :  { %1248 = vadd.xlane.f32.xlu0 %v1247_v29  ;;  %v2757_v29 = vld [vmem:[#allocation8 + $0x60] sm:$0xff]  }
 0x6ee   :  { %1259 = vrot.lane.b32.xlu1 %v3292_v45, %s3014_s18 }
 0x6f2   :  { %1263 = vrot.lane.b32.xlu1 %v3304_v7, %s3014_s18 }
 0x6f5   :  { %1261 = vrot.lane.b32.xlu0 %v3298_v59, %s3014_s18 }
 0x6f6   :  { %1265 = vrot.lane.b32.xlu1 %v3310_v21, %s3014_s18 }
 0x6fa   :  { %1536 = vrot.lane.b32.xlu1 %v3294_v46, %s3014_s18 }
 0x6fe   :  { %1538 = vrot.lane.b32.xlu1 %v3300_v60, %s3014_s18 }
 0x702   :  { %1542 = vrot.lane.b32.xlu1 %v3312_v22, %s3014_s18 }
 0x762   :  { %v1511_v4 = vpop.xlane.xlu1 %1510 }
 0x763   :  { %v1515_v45 = vsub.f32 %v1503_v36, %v1511_v4  ;;  %v2758_v4 = vld [vmem:[#allocation8 + $0x20] sm:$0xff]  }
 0x764   :  { %v1514_v23 = vpop.xlane.xlu0 %1513 }
 0x765   :  { %v1517_v30 = vmul.f32 1.442695, %v1515_v45  ;;  %v1516_v7 = vsub.f32 %v1506_v17, %v1514_v23  ;;  %v2759_v45 = vld [vmem:[#allocation8 + $0x68] sm:$0xff]  }
 0x766   :  { %v1108_v13 = vpop.xlane.xlu1 %1107  ;;  %v2760_v23 = vld [vmem:[#allocation8 + $0x28] sm:$0xff]  }
 0x767   :  { %2853 = vpow2.f32 %v1517_v30  ;;  %v1519_v59 = vmul.f32 1.442695, %v1516_v7  ;;  %v2761_v30 = vld [vmem:[#allocation8 + $0x70] sm:$0xff]  }
 0x768   :  { %2855 = vrcp.f32 %v1108_v13  ;;  %v1111_v15 = vpop.xlane.xlu0 %1110  ;;  %v2762_v7 = vld [vmem:[#allocation8 + $0x30] sm:$0xff]  }
 0x769   :  { %2857 = vpow2.f32 %v1519_v59 }
 0x76a   :  { %2859 = vrcp.f32 %v1111_v15  ;;  %v1246_v21 = vpop.xlane.xlu1 %1245 }
 0x76c   :  { %v1249_v14 = vpop.xlane.xlu0 %1248 }
 0x76d   :  { %2861 = vrcp.f32 %v1249_v14  ;;  %v2765_v14 = vld [vmem:[#allocation7 + $0x20] ss:$44 sps:$4 sm:$0xff]  }
 0x76e   :  { %v1260_v37 = vpop.permute.xlu1 %1259  ;;  %2863 = vrcp.f32 %v1246_v21 }
 0x770   :  { %v1262_v43 = vpop.permute.xlu0 %1261 }
 0x771   :  { %v2854_v46 = vpop.eup %2853 }
 0x772   :  { %v2856_v31 = vpop.eup %2855  ;;  %v1521_v60 = vsel %vm1037_vm1, %v2854_v46, 0.0  ;;  %v1264_v42 = vpop.permute.xlu1 %1263 }
 0x773   :  { %v2858_v32 = vpop.eup %2857  ;;  %1522 = vadd.xlane.f32.xlu0 %v1521_v60  ;;  %v1114_v33 = vmul.f32 %v2856_v31, %v2846_v20  ;;  %v2763_v60 = vld [vmem:[#allocation8 + $0x78] sm:$0xff]  }
 0x774   :  { %v2860_v22 = vpop.eup %2859  ;;  %v1524_v38 = vsel %vm1037_vm1, %v2858_v32, 0.0 }
 0x775   :  { %v1115_v34 = vmul.f32 %v2860_v22, %v2848_v25  ;;  %v2751_v25 = vld [vmem:[#allocation8 + $0x48] sm:$0xff]  }
 0x776   :  { %v1266_v12 = vpop.permute.xlu1 %1265  ;;  %v2767_v22 = vld [vmem:[#allocation7 + $0x24] ss:$44 sps:$4 sm:$0xff]  }
 0x777   :  { %1525 = vadd.xlane.f32.xlu0 %v1524_v38  ;;  %v1116_v41 = vpack.c.bf16 %v1115_v34, %v1114_v33  ;;  %v2862_v44 = vpop.eup %2861  ;;  %v2770_v33 = vld [vmem:[#allocation7 + $0x7c] ss:$44 sps:$4 sm:$0xff]   ;;  %1899 = vmatprep.subr.bf16.mxu0 %v2767_v22  ;;  %v2768_v38 = vld [vmem:[#allocation7 + $0x78] ss:$44 sps:$4 sm:$0xff]  }
 0x778   :  { %v2864_v47 = vpop.eup %2863  ;;  %v1253_v52 = vmul.f32 %v2862_v44, %v2852_v28  ;;  %v2755_v28 = vld [vmem:[#allocation8 + $0x58] sm:$0xff]   ;;  %1900 = vmatpush1.bf16.msra.mxu0 %v2765_v14 }
 0x779   :  { %2553 = vmatmul.mubr.msk.bf16.vlgmr.msra.gmra.mrb[44].mxu1 %vm1037_vm1, %v1116_v41  ;;  %v1252_v53 = vmul.f32 %v2864_v47, %v2850_v27  ;;  %v2753_v27 = vld [vmem:[#allocation8 + $0x50] sm:$0xff]   ;;  %1901 = vmatprep.subr.bf16.mxu0 %v2770_v33 }
 0x77a   :  { %2569 = vmatpush3.bf16.msra.mxu1 %v1260_v37  ;;  %2576 = vmatprep.mubr.msk.bf16.mxu1 %vm3021_vm0, %v3020_v0  ;;  %v1537_v55 = vpop.permute.xlu1 %1536  ;;  %v2776_v47 = vld [vmem:[#allocation7 + $0x12c] ss:$44 sps:$4 sm:$0xff]  }
 0x77b   :  { %2570 = vmatprep.subr.bf16.mxu1 %v3020_v0  ;;  %v1254_v58 = vpack.c.bf16 %v1253_v52, %v1252_v53  ;;  %v2774_v52 = vld [vmem:[#allocation7 + $0x128] ss:$44 sps:$4 sm:$0xff]   ;;  %v2779_v53 = vld [vmem:[#allocation7 + $0x184] ss:$44 sps:$4 sm:$0xff]  }
 0x77c   :  { %1902 = vmatpush1.bf16.msra.mxu0 %v2768_v38 }
 0x77e   :  { %2571 = vmatpush3.bf16.msra.mxu1 %v1262_v43  ;;  %v1539_v62 = vpop.permute.xlu1 %1538 }
 0x77f   :  { %2572 = vmatprep.subr.bf16.mxu1 %v3020_v0 }
 0x782   :  { %2573 = vmatpush3.bf16.msra.mxu1 %v1264_v42  ;;  %v1543_v3 = vpop.permute.xlu1 %1542  ;;  %v2773_v42 = vld [vmem:[#allocation7 + $0xd4] ss:$44 sps:$4 sm:$0xff]  }
 0x783   :  { %2574 = vmatprep.subr.bf16.mxu1 %v3020_v0  ;;  %1903 = vmatprep.subr.bf16.mxu0 %v2773_v42 }
 0x786   :  { %2575 = vmatpush3.bf16.msra.mxu1 %v1266_v12  ;;  %v2771_v12 = vld [vmem:[#allocation7 + $0xd0] ss:$44 sps:$4 sm:$0xff]  }
 0x787   :  { %2616 = vmatprep.subr.bf16.mxu1 %v3020_v0  ;;  %1904 = vmatpush1.bf16.msra.mxu0 %v2771_v12  ;;  %v2833_v12 = vld [vmem:[#allocation10 + $0xe4] ss:$8 sps:$4 sm:$0xff]  }
 0x788   :  { %1905 = vmatprep.subr.bf16.mxu0 %v2776_v47  ;;  %v2831_v47 = vld [vmem:[#allocation10 + $0xe0] ss:$8 sps:$4 sm:$0xff]  }
 0x789   :  { %2577 = vmatmul.mubr.msk.bf16.vlgmr.msra.gmra.mrb[48].mxu1 %vm1037_vm1, %v1254_v58 }
 0x78a   :  { %2617 = vmatpush3.bf16.msra.mxu1 %v1537_v55  ;;  %2624 = vmatprep.mubr.msk.bf16.mxu1 %vm3021_vm0, %v3020_v0  ;;  %v2777_v55 = vld [vmem:[#allocation7 + $0x180] ss:$44 sps:$4 sm:$0xff]  }
 0x78b   :  { %2618 = vmatprep.subr.bf16.mxu1 %v3020_v0  ;;  %1906 = vmatpush1.bf16.msra.mxu0 %v2774_v52  ;;  %v2836_v52 = vld [vmem:[#allocation10 + $0xf4] ss:$8 sps:$4 sm:$0xff]  }
 0x78c   :  { %1907 = vmatprep.subr.bf16.mxu0 %v2779_v53  ;;  %v2834_v53 = vld [vmem:[#allocation10 + $0xf0] ss:$8 sps:$4 sm:$0xff]  }
 0x78d   :  { %1540 = vrot.lane.b32.xlu0 %v3306_v8, %s3014_s18 }
 0x78e   :  { %2619 = vmatpush3.bf16.msra.mxu1 %v1539_v62 }
 0x78f   :  { %2620 = vmatprep.subr.bf16.mxu1 %v3020_v0  ;;  %1908 = vmatpush1.bf16.msra.mxu0 %v2777_v55  ;;  %v1808_v55 = vld [vmem:[#allocation7 + $0x2e0] sm:$0x11] }
 0x800   :  { %v1523_v63 = vpop.xlane.xlu0 %1522 }
 0x801   :  { %2865 = vrcp.f32 %v1523_v63 }
 0x804   :  { %v1526_v1 = vpop.xlane.xlu0 %1525 }
 0x805   :  { %2867 = vrcp.f32 %v1526_v1 }
 0x808   :  { %v1541_v2 = vpop.permute.xlu0 %1540 }
 0x809   :  { %2621 = vmatpush3.bf16.msra.mxu1 %v1541_v2 }
 0x80a   :  { %2622 = vmatprep.subr.bf16.mxu1 %v3020_v0  ;;  %v2749_v0 = vld [vmem:[#allocation8 + $0x40] sm:$0xff]  }
 0x80b   :  { %v2866_v5 = vpop.eup %2865 }
 0x80c   :  { %v1529_v6 = vmul.f32 %v2866_v5, %v2854_v46  ;;  %v2780_v5 = vld [vmem:[#allocation7 + $0x1d8] ss:$44 sps:$4 sm:$0xff]  }
 0x80d   :  { %2623 = vmatpush3.bf16.msra.mxu1 %v1543_v3 }
 0x80e   :  { %2438 = vmatprep.subr.bf16.mxu1 %v2749_v0  ;;  %v2806_v0 = vld [vmem:[#allocation10 + $0x54] ss:$8 sps:$4 sm:$0xff]  }
 0x80f   :  { %v2868_v35 = vpop.eup %2867 }
 0x810   :  { %v1530_v9 = vmul.f32 %v2868_v35, %v2858_v32  ;;  %v2764_v32 = vld [vmem:[#allocation8 + $0x38] sm:$0xff]   ;;  %v2782_v35 = vld [vmem:[#allocation7 + $0x1dc] ss:$44 sps:$4 sm:$0xff]  }
 0x811   :  { %1909 = vmatprep.subr.bf16.mxu0 %v2782_v35 }
 0x812   :  { %v1531_v40 = vpack.c.bf16 %v1530_v9, %v1529_v6  ;;  %1910 = vmatpush1.bf16.msra.mxu0 %v2780_v5  ;;  %v2785_v6 = vld [vmem:[#allocation7 + $0x234] ss:$44 sps:$4 sm:$0xff]   ;;  %v2783_v9 = vld [vmem:[#allocation7 + $0x230] ss:$44 sps:$4 sm:$0xff]  }
 0x813   :  { %1911 = vmatprep.subr.bf16.mxu0 %v2785_v6 }
 0x814   :  { %2625 = vmatmul.mubr.msk.bf16.vlgmr.msra.gmra.mrb[52].mxu1 %vm1037_vm1, %v1531_v40  ;;  %v2788_v40 = vld [vmem:[#allocation7 + $0x28c] ss:$44 sps:$4 sm:$0xff]  }
 0x815   :  { %2439 = vmatpush3.bf16.msra.mxu1 %v2750_v24  ;;  %v2804_v24 = vld [vmem:[#allocation10 + $0x50] ss:$8 sps:$4 sm:$0xff]  }
 0x816   :  { %2440 = vmatprep.subr.bf16.mxu1 %v2751_v25  ;;  %1912 = vmatpush1.bf16.msra.mxu0 %v2783_v9  ;;  %v2809_v25 = vld [vmem:[#allocation10 + $0x64] ss:$8 sps:$4 sm:$0xff]  }
 0x817   :  { %1913 = vmatprep.subr.bf16.mxu0 %v2788_v40 }
 0x819   :  { %2441 = vmatpush3.bf16.msra.mxu1 %v2752_v26  ;;  %v2807_v26 = vld [vmem:[#allocation10 + $0x60] ss:$8 sps:$4 sm:$0xff]  }
 0x81a   :  { %2442 = vmatprep.subr.bf16.mxu1 %v2753_v27  ;;  %v2812_v27 = vld [vmem:[#allocation10 + $0x74] ss:$8 sps:$4 sm:$0xff]  }
 0x81d   :  { %2443 = vmatpush3.bf16.msra.mxu1 %v2754_v48  ;;  %v2810_v48 = vld [vmem:[#allocation10 + $0x70] ss:$8 sps:$4 sm:$0xff]  }
 0x81e   :  { %2444 = vmatprep.subr.bf16.mxu1 %v2755_v28  ;;  %v2815_v28 = vld [vmem:[#allocation10 + $0x84] ss:$8 sps:$4 sm:$0xff]  }
 0x821   :  { %2445 = vmatpush3.bf16.msra.mxu1 %v2756_v61  ;;  %v2813_v61 = vld [vmem:[#allocation10 + $0x80] ss:$8 sps:$4 sm:$0xff]  }
 0x822   :  { %2446 = vmatprep.subr.bf16.mxu1 %v2757_v29  ;;  %v2818_v29 = vld [vmem:[#allocation10 + $0x94] ss:$8 sps:$4 sm:$0xff]  }
 0x825   :  { %2447 = vmatpush3.bf16.msra.mxu1 %v2758_v4  ;;  %v2816_v4 = vld [vmem:[#allocation10 + $0x90] ss:$8 sps:$4 sm:$0xff]  }
 0x826   :  { %2448 = vmatprep.subr.bf16.mxu1 %v2759_v45  ;;  %v2821_v45 = vld [vmem:[#allocation10 + $0xa4] ss:$8 sps:$4 sm:$0xff]  }
 0x829   :  { %2449 = vmatpush3.bf16.msra.mxu1 %v2760_v23  ;;  %v2819_v23 = vld [vmem:[#allocation10 + $0xa0] ss:$8 sps:$4 sm:$0xff]  }
 0x82a   :  { %2450 = vmatprep.subr.bf16.mxu1 %v2761_v30  ;;  %v2824_v30 = vld [vmem:[#allocation10 + $0xb4] ss:$8 sps:$4 sm:$0xff]  }
 0x82d   :  { %2451 = vmatpush3.bf16.msra.mxu1 %v2762_v7  ;;  %v2822_v7 = vld [vmem:[#allocation10 + $0xb0] ss:$8 sps:$4 sm:$0xff]  }
 0x82e   :  { %2452 = vmatprep.subr.bf16.mxu1 %v2763_v60 }
 0x831   :  { %2453 = vmatpush3.bf16.msra.mxu1 %v2764_v32 }
 0x84c   :  { %v1154_v8 = vpop.f32.mrb[44].mxu1 }
 0x84d   :  { %v2554_v10 = vpop.f32.mrb[45].mxu1 }
 0x84e   :  { %v1157_v36 = vpop.f32.mrb[46].mxu1  ;;  %v2789_v10 = vld [vmem:[#allocation10] ss:$8 sps:$4 sm:$0xff]  }
 0x84f   :  { %v2555_v11 = vpop.f32.mrb[47].mxu1 }
 0x850   :  { %v2797_v11 = vld [vmem:[#allocation10 + $0x24] ss:$8 sps:$4 sm:$0xff]  }
 0x85c   :  { %v1308_v16 = vpop.f32.mrb[48].mxu1 }
 0x85d   :  { %v2578_v17 = vpop.f32.mrb[49].mxu1 }
 0x85e   :  { %v1311_v18 = vpop.f32.mrb[50].mxu1  ;;  %v2800_v17 = vld [vmem:[#allocation10 + $0x34] ss:$8 sps:$4 sm:$0xff]  }
 0x85f   :  { %v2651_v19 = vpack.i.bf16 %v1311_v18, %v1308_v16  ;;  %v2579_v20 = vpop.f32.mrb[51].mxu1  ;;  %v2795_v16 = vld [vmem:[#allocation10 + $0x20] ss:$8 sps:$4 sm:$0xff]   ;;  %v2798_v18 = vld [vmem:[#allocation10 + $0x30] ss:$8 sps:$4 sm:$0xff]  }
 0x860   :  { %v2801_v20 = vld [vmem:[#allocation10 + $0x40] ss:$8 sps:$4 sm:$0xff]  }
 0x861   :  { %2652 = vrot.lane.b32.xlu1 %v2651_v19, %s3014_s18  ;;  %v2803_v19 = vld [vmem:[#allocation10 + $0x44] ss:$8 sps:$4 sm:$0xff]  }
 0x8d3   :  { %v2653_v13 = vpop.permute.xlu1 %2652 }
 0x8d4   :  { %v2655_v59 = vunpack.i.h.bf16 %v2653_v13  ;;  %v2654_v15 = vunpack.i.l.bf16 %v2653_v13  ;;  %v2827_v13 = vld [vmem:[#allocation10 + $0xc4] ss:$8 sps:$4 sm:$0xff]  }
 0x8d6   :  { %v1609_v21 = vsel %vm1037_vm1, %v1157_v36, %v2655_v59  ;;  %v1608_v46 = vsel %vm1037_vm1, %v1154_v8, %v2654_v15  ;;  %v2786_v8 = vld [vmem:[#allocation7 + $0x288] ss:$44 sps:$4 sm:$0xff]  }
 0x8d7   :  { %v1612_v31 = vpack.c.bf16 %v1609_v21, %v1608_v46  ;;  %1914 = vmatpush1.bf16.msra.mxu0 %v2786_v8  ;;  %v2794_v36 = vld [vmem:[#allocation10 + $0x14] ss:$8 sps:$4 sm:$0xff]   ;;  %v2825_v59 = vld [vmem:[#allocation10 + $0xc0] ss:$8 sps:$4 sm:$0xff]   ;;  %v2828_v21 = vld [vmem:[#allocation10 + $0xd0] ss:$8 sps:$4 sm:$0xff]  }
 0x8d8   :  { %v2830_v15 = vld [vmem:[#allocation10 + $0xd4] ss:$8 sps:$4 sm:$0xff]   ;;  %v1646_v46 = vld [vmem:[#allocation8 + $0x80] sm:$0x1] }
 0x8e7   :  { %v1585_v34 = vpop.f32.mrb[52].mxu1 }
 0x8e8   :  { %v2626_v37 = vpop.f32.mrb[53].mxu1 }
 0x8e9   :  { %v1588_v41 = vpop.f32.mrb[54].mxu1 }
 0x8ea   :  { %v2646_v43 = vpack.i.bf16 %v1588_v41, %v1585_v34  ;;  %v2627_v44 = vpop.f32.mrb[55].mxu1 }
 0x8ec   :  { %2647 = vrot.lane.b32.xlu0 %v2646_v43, %s3014_s18 }
 0x95e   :  { %v2648_v58 = vpop.permute.xlu0 %2647 }
 0x95f   :  { %v2650_v62 = vunpack.i.h.bf16 %v2648_v58  ;;  %v2649_v63 = vunpack.i.l.bf16 %v2648_v58  ;;  %v1809_v58 = vunpack.c.l.bf16 %v1808_v55 }
 0x961   :  { %v1610_v1 = vsel %vm1037_vm1, %v3390_v50, %v2649_v63  ;;  %v1611_v2 = vsel %vm1037_vm1, %v3392_v49, %v2650_v62  ;;  %v2791_v50 = vld [vmem:[#allocation10 + $0x4] ss:$8 sps:$4 sm:$0xff]   ;;  %v2792_v49 = vld [vmem:[#allocation10 + $0x10] ss:$8 sps:$4 sm:$0xff]   ;;  %v1810_v62 = vunpack.c.h.bf16 %v1808_v55  ;;  %v1814_v63 = vrot.slane %v1809_v58, %v3159_v39 }
 0x962   :  { %v1613_v3 = vpack.c.bf16 %v1611_v2, %v1610_v1  ;;  %2151 = vmatprep.subr.bf16.mxu1 %v2791_v50 }
 0x963   :  { %v1818_v51 = vrot.slane %v1810_v62, %v3159_v39 }
 0x964   :  { %1780 = vmatprep.mubr.bf16.mxu1 %v1613_v3 }
 0x965   :  { %1781 = vmatmul.mubr.bf16.vlgmr.msra.gmra.mrb[56].mxu1 %v1612_v31  ;;  %v1647_v31 = vunpack.c.l.bf16 %v1646_v46 }
 0x966   :  { %2152 = vmatpush1.bf16.msra.mxu1 %v2789_v10 }
 0x967   :  { %2153 = vmatprep.subr.bf16.mxu1 %v2794_v36  ;;  %v1651_v32 = vrot.slane %v1647_v31, %v3159_v39  ;;  %v2194_v36 = vld [vmem:[#allocation7 + $0x2e8] sm:$0x1] }
 0x96a   :  { %2154 = vmatpush1.bf16.msra.mxu1 %v2792_v49  ;;  %v1978_v49 = vld [vmem:[#allocation10 + $0x100] sm:$0x11] }
 0x96b   :  { %2155 = vmatprep.subr.bf16.mxu1 %v2797_v11  ;;  %v2195_v11 = vunpack.c.l.bf16 %v2194_v36 }
 0x96e   :  { %2156 = vmatpush1.bf16.msra.mxu1 %v2795_v16  ;;  %v1979_v16 = vunpack.c.l.bf16 %v1978_v49 }
 0x96f   :  { %2157 = vmatprep.subr.bf16.mxu1 %v2800_v17  ;;  %v1980_v17 = vunpack.c.h.bf16 %v1978_v49 }
 0x972   :  { %2158 = vmatpush1.bf16.msra.mxu1 %v2798_v18  ;;  %v2201_v18 = vrot.slane %v2195_v11, %v3159_v39 }
 0x973   :  { %2159 = vmatprep.subr.bf16.mxu1 %v2803_v19  ;;  %v2196_v19 = vld [vmem:[#allocation5] sm:$0xff] }
 0x976   :  { %2160 = vmatpush1.bf16.msra.mxu1 %v2801_v20  ;;  %v1986_v20 = vrot.slane %v1979_v16, %v3159_v39 }
 0x977   :  { %2161 = vmatprep.subr.bf16.mxu1 %v2806_v0  ;;  %v1990_v0 = vrot.slane %v1980_v17, %v3159_v39 }
 0x97a   :  { %2162 = vmatpush1.bf16.msra.mxu1 %v2804_v24  ;;  %v2197_v24 = vld [vmem:[#allocation5 + $0x8] sm:$0xff] }
 0x97b   :  { %2163 = vmatprep.subr.bf16.mxu1 %v2809_v25  ;;  %v2202_v25 = vmul.f32 %v2201_v18, %v2196_v19 }
 0x97e   :  { %2164 = vmatpush1.bf16.msra.mxu1 %v2807_v26 }
 0x97f   :  { %2165 = vmatprep.subr.bf16.mxu1 %v2812_v27 }
 0x982   :  { %2166 = vmatpush1.bf16.msra.mxu1 %v2810_v48 }
 0x983   :  { %2167 = vmatprep.subr.bf16.mxu1 %v2815_v28  ;;  %v2203_v28 = vmul.f32 %v2201_v18, %v2197_v24 }
 0x986   :  { %2168 = vmatpush1.bf16.msra.mxu1 %v2813_v61 }
 0x987   :  { %2169 = vmatprep.subr.bf16.mxu1 %v2818_v29 }
 0x98a   :  { %2170 = vmatpush1.bf16.msra.mxu1 %v2816_v4 }
 0x98b   :  { %2171 = vmatprep.subr.bf16.mxu1 %v2821_v45 }
 0x98e   :  { %2172 = vmatpush1.bf16.msra.mxu1 %v2819_v23 }
 0x98f   :  { %2173 = vmatprep.subr.bf16.mxu1 %v2824_v30 }
 0x992   :  { %2174 = vmatpush1.bf16.msra.mxu1 %v2822_v7 }
 0x993   :  { %2175 = vmatprep.subr.bf16.mxu1 %v2827_v13 }
 0x996   :  { %2176 = vmatpush1.bf16.msra.mxu1 %v2825_v59 }
 0x997   :  { %2177 = vmatprep.subr.bf16.mxu1 %v2830_v15 }
 0x99a   :  { %2178 = vmatpush1.bf16.msra.mxu1 %v2828_v21 }
 0x99b   :  { %2179 = vmatprep.subr.bf16.mxu1 %v2833_v12 }
 0x99e   :  { %2180 = vmatpush1.bf16.msra.mxu1 %v2831_v47 }
 0x99f   :  { %2181 = vmatprep.subr.bf16.mxu1 %v2836_v52 }
 0x9a2   :  { %2182 = vmatpush1.bf16.msra.mxu1 %v2834_v53 }
 0xa38   :  { %v2454_v60 = vpop.f32.mrb[56].mxu1 }
 0xa39   :  { %v2455_v14 = vpop.f32.mrb[57].mxu1 }
 0xa3a   :  { %v2456_v22 = vadd.f32 %v2455_v14, %v2454_v60  ;;  %v2457_v33 = vpop.f32.mrb[58].mxu1 }
 0xa3b   :  { %v2458_v34 = vpop.f32.mrb[59].mxu1 }
 0xa3c   :  { %v1783_v37 = vadd.f32 %v2456_v22, %v1651_v32  ;;  %v2459_v38 = vadd.f32 %v2458_v34, %v2457_v33 }
 0xa3e   :  { %v1786_v41 = vadd.f32 %v2459_v38, %v1651_v32  ;;  %v1789_v42 = vadd.f32 %v1783_v37, %v431_v56 }
 0xa40   :  { %v1790_v43 = vadd.f32 %v1786_v41, %v432_v57 }
 0xa42   :  { %v1791_v44 = vpack.c.bf16 %v1790_v43, %v1789_v42 }
 0xa44   :  { %1932 = vmatmul.mubr.bf16.vlgmr.msra.gmra.mrb[76].mxu0 %v1791_v44 }
 0xb17   :  { %v1933_v56 = vpop.f32.mrb[76].mxu0 }
 0xb18   :  { %v1934_v54 = vadd.f32 %v1933_v56, %v1814_v63  ;;  %v1935_v57 = vpop.f32.mrb[77].mxu0 }
 0xb19   :  { %v1936_v1 = vadd.f32 %v1935_v57, %v1818_v51  ;;  %v1937_v2 = vpop.f32.mrb[78].mxu0 }
 0xb1a   :  { %v1938_v3 = vadd.f32 %v1937_v2, %v1814_v63  ;;  %v1939_v5 = vpop.f32.mrb[79].mxu0  ;;  %v1942_v6 = vmax.f32 %v1934_v54, 0.0 }
 0xb1b   :  { %v1940_v35 = vadd.f32 %v1939_v5, %v1818_v51  ;;  %v1943_v40 = vmax.f32 %v1936_v1, 0.0 }
 0xb1c   :  { %v1944_v9 = vmax.f32 %v1938_v3, 0.0 }
 0xb1d   :  { %v1945_v8 = vmax.f32 %v1940_v35, 0.0 }
 0xb1e   :  { %v1981_v10 = vpack.c.bf16 %v1944_v9, %v1942_v6 }
 0xb1f   :  { %v1982_v50 = vpack.c.bf16 %v1945_v8, %v1943_v40 }
 0xb21   :  { %2183 = vmatprep.mubr.bf16.mxu1 %v1982_v50 }
 0xb22   :  { %2184 = vmatmul.mubr.bf16.vlgmr.msra.gmra.mrb[60].mxu1 %v1981_v10 }
 0xbf5   :  { %v2185_v26 = vpop.f32.mrb[60].mxu1 }
 0xbf6   :  { %v2186_v27 = vadd.f32 %v2185_v26, %v1986_v20  ;;  %v2187_v48 = vpop.f32.mrb[61].mxu1 }
 0xbf7   :  { %v2188_v61 = vadd.f32 %v2187_v48, %v1990_v0  ;;  %v2189_v29 = vpop.f32.mrb[62].mxu1 }
 0xbf8   :  { %v2204_v4 = vadd.f32 %v2202_v25, %v2186_v27  ;;  %2208 = vst [vmem:[#allocation11 + $0x8] sm:$0xff] %v2186_v27  ;;  %v2190_v45 = vadd.f32 %v2189_v29, %v1986_v20  ;;  %v2191_v23 = vpop.f32.mrb[63].mxu1 }
 0xbf9   :  { %2209 = vst [vmem:[#allocation11 + $0x10] sm:$0xff] %v2188_v61  ;;  %v2192_v30 = vadd.f32 %v2191_v23, %v1990_v0 }
 0xbfa   :  { %2206 = vst [vmem:[#allocation11] sm:$0xff] %v2204_v4  ;;  %v2205_v7 = vadd.f32 %v2203_v28, %v2190_v45  ;;  %2210 = vst [vmem:[#allocation11 + $0x20] sm:$0xff] %v2190_v45 }
 0xbfb   :  { %2211 = vst [vmem:[#allocation11 + $0x28] sm:$0xff] %v2192_v30 }
 0xbfc   :  { %2207 = vst [vmem:[#allocation11 + $0x18] sm:$0xff] %v2205_v7 }
 0xbfd   :  { %2990 = shalt.err (!%p2987_p2)
}
 0xbfe   :  { %s2991_s9 = scalar_lea.hbm %s3468_s5, 768 }
 0xbff   :  { %p2992_p3 = scmp.ne.s32.totalorder %s3468_s5, %s2991_s9  ;;  %p2995_p4 = scmp.lt.u32.totalorder %s2991_s9, %s3468_s5 }
 0xc01   :  { %p2997_p5 = pnand %p2995_p4, %p2992_p3 }
 0xc03   :  { %3000 = shalt.err (!%p2997_p5)
}
 0xc04   :  { %s3025_s15 = smov 384   ;;  %s3026_s16 = smov 24  }
 0xc05   :  { %2223 = dma.vmem_to_hbm [thread:$0]  %s2218_s28, 768, %s3468_s5, [#allocation4], %s3025_s15, %s3025_s15, %s3026_s16  }
 0xc06   :  { %3007 = dma.done.wait [#allocation4], 768  }
 0xc07   :  { %3008 = vsyncadd [#allocation4], 4294966528 }
 0xc08   :  { %2227 = vsyncpa [#allocation3], 1 }
 0xc09   :  { %2228 = vsyncpa [#allocation6], 1 }
 0xc0a   :  { %2229 = vsyncpa [#allocation9], 1 }
 0xc0b   :  { %2230 = vsyncpa [#allocation4], 1 }

</bundles_post_ra>
